<compile_context>
chip_gen: v7x
topology: tpu7x:2x2x1
jax: 0.10.0
libtpu: 0.0.40
codegen_flags: <defaults>
</compile_context>

<pallas_src>
import jax
import jax.numpy as jnp
from jax import lax
from jax.experimental import pallas as pl
from jax.experimental.pallas import tpu as pltpu

CLIP_VAL = 8
FRACTION_BITS = 12
_SCALE = float(2 ** FRACTION_BITS)
_INV_SCALE = 1.0 / _SCALE
_EPS = _INV_SCALE
_LIM = CLIP_VAL - _EPS
_INV_SQRT2 = 0.7071067811865476


def _round_up(x, m):
    return ((x + m - 1) // m) * m


def _trunc_fxp(x):
    # torch: (x * 2^12).to(torch.int) / 2^12  — truncation toward zero.
    # int32 round-trip is 2 converts + 1 mul (cheaper than jnp.trunc lowering).
    return (x * _SCALE).astype(jnp.int32).astype(jnp.float32) * _INV_SCALE


def _make_fxp(x):
    # Single clip == the two torch wheres, then truncate.
    return _trunc_fxp(jnp.clip(x, -_LIM, _LIM))


def feedforward_kernel(x_ref, w1_ref, b1_ref, w2_ref, b2_ref, o_ref):
    # ff1: (TM, Dp) @ (Dp, Hp) on the MXU, f32 accumulation, explicit precision.
    h = jnp.dot(x_ref[...], w1_ref[...],
                precision=lax.Precision.HIGHEST,
                preferred_element_type=jnp.float32)
    h = h + b1_ref[...]
    h = _make_fxp(h)

    # exact GELU (torch.nn.GELU default, erf form)
    h = 0.5 * h * (1.0 + lax.erf(h * _INV_SQRT2))
    # post-GELU fxp: input was in [-LIM, LIM] so GELU(h) in (-0.17, LIM];
    # clip is provably a no-op -> truncation only.
    h = _trunc_fxp(h)
    # drop1 (p=0.0) + its make_fxp: identity + idempotent fxp -> skipped.

    # ff2: (TM, Hp) @ (Hp, Dp) on the MXU; `h` stays live in vregs/VMEM temp,
    # no explicit scratch round-trip.
    y = jnp.dot(h, w2_ref[...],
                precision=lax.Precision.HIGHEST,
                preferred_element_type=jnp.float32)
    y = y + b2_ref[...]
    y = _make_fxp(y)
    # drop2 (p=0.0) + its make_fxp: identity + idempotent fxp -> skipped.

    o_ref[...] = y.astype(o_ref.dtype)


def _vmem_capacity_bytes():
    try:
        info = pltpu.get_tpu_info()
        cap = getattr(info, "vmem_capacity_bytes", None)
        if cap:
            return int(cap)
    except Exception:
        pass
    return 64 << 20  # conservative (v7x per-TC) fallback


def _pad2d(a, rows, cols):
    r, c = a.shape
    if (r, c) == (rows, cols):
        return a
    return jnp.zeros((rows, cols), a.dtype).at[:r, :c].set(a)


def feedforward(x, w1, b1, w2, b2, *, tm=None):
    """x: (B, N, dim); w1: (dim, hidden); b1: (hidden,); w2: (hidden, dim); b2: (dim,)."""
    B, N, D = x.shape
    H = w1.shape[1]
    M = B * N

    # Generation-aware budget / tile defaults.
    cap = _vmem_capacity_bytes()
    vmem_limit = int(cap * 3 // 4)              # 96 MiB on v5e/v6e, 48 MiB on v7x
    if tm is None:
        tm = 512 if cap >= (96 << 20) else 256
    tm = max(8, _round_up(int(tm), 8))          # defensive (8,128) alignment

    # Lane-dense / (8,128)-aligned padded shapes; padding is exact (zero pads
    # contribute 0) and skipped entirely when dims are already aligned.
    Dp = _round_up(D, 128)
    Hp = _round_up(H, 128)
    Mp8 = _round_up(M, 8)

    TM = min(tm, Mp8)
    # Megacore balance (v7x): make sure both TensorCores get at least one tile.
    if Mp8 > 8 and TM >= Mp8:
        TM = _round_up(-(-Mp8 // 2), 8)

    # Shrink TM if the estimated VMEM footprint would blow the budget.
    w_itemsize = jnp.dtype(w1.dtype).itemsize
    x_itemsize = jnp.dtype(x.dtype).itemsize
    weight_bytes = (Dp * Hp + Hp * Dp) * w_itemsize + (Hp + Dp) * 4  # single-buffered
    def _est(tm_):
        io = 2 * 2 * tm_ * Dp * x_itemsize       # x + out tiles, double-buffered
        inter = 2 * tm_ * Hp * 4                 # compiler temps for h (rough)
        return weight_bytes + io + inter
    while TM > 8 and _est(TM) > int(0.85 * vmem_limit):
        TM = max(8, _round_up(TM // 2, 8))

    Mp = _round_up(M, TM)
    grid = (Mp // TM,)

    x2 = _pad2d(x.reshape(M, D), Mp, Dp)
    w1p = _pad2d(w1, Dp, Hp)
    w2p = _pad2d(w2, Hp, Dp)
    b1p = _pad2d(b1.astype(jnp.float32).reshape(1, H), 1, Hp)
    b2p = _pad2d(b2.astype(jnp.float32).reshape(1, D), 1, Dp)

    bytes_accessed = int(
        Mp * Dp * x_itemsize            # x in
        + Dp * Hp * w_itemsize          # W1 (resident, read once)
        + Hp * Dp * w_itemsize          # W2 (resident, read once)
        + Mp * Dp * x_itemsize          # out
    )
    cost = pl.CostEstimate(
        flops=int(4 * Mp * Dp * Hp),    # two matmuls, 2*M*D*H each
        transcendentals=0,              # erf lowers to a VALU polynomial
        bytes_accessed=bytes_accessed,
    )

    def _build(single_buffer_weights):
        res = ({"pipeline_mode": pl.Buffered(1)} if single_buffer_weights else {})
        in_specs = [
            pl.BlockSpec((TM, Dp), lambda i: (i, 0)),           # x tile, pipelined
            pl.BlockSpec((Dp, Hp), lambda i: (0, 0), **res),    # W1 resident
            pl.BlockSpec((1, Hp), lambda i: (0, 0), **res),     # b1 resident
            pl.BlockSpec((Hp, Dp), lambda i: (0, 0), **res),    # W2 resident
            pl.BlockSpec((1, Dp), lambda i: (0, 0), **res),     # b2 resident
        ]
        return pl.pallas_call(
            feedforward_kernel,
            out_shape=jax.ShapeDtypeStruct((Mp, Dp), x.dtype),
            grid=grid,
            in_specs=in_specs,
            out_specs=pl.BlockSpec((TM, Dp), lambda i: (i, 0)),
            compiler_params=pltpu.CompilerParams(
                dimension_semantics=("parallel",),   # megacore split on v7x
                vmem_limit_bytes=vmem_limit,
            ),
            cost_estimate=cost,
        )

    try:
        out = _build(True)(x2, w1p, b1p, w2p, b2p)
    except Exception:
        # Fallback: default (double) buffering for the resident operands.
        out = _build(False)(x2, w1p, b1p, w2p, b2p)

    return out[:M, :D].reshape(B, N, D)


if __name__ == "__main__":
    # Small, deterministic example: batch=2, seq=8, dim=32, hidden=64
    B, N, DIM, HID = 2, 8, 32, 64
    key = jax.random.PRNGKey(0)
    kx, kw1, kb1, kw2, kb2 = jax.random.split(key, 5)

    x = jax.random.normal(kx, (B, N, DIM), dtype=jnp.float32)

    # Deterministic parameter init (mimic nn.Linear's U(-1/sqrt(fan_in), ...)).
    lim1 = 1.0 / jnp.sqrt(DIM)
    lim2 = 1.0 / jnp.sqrt(HID)
    # Stored already-transposed: w1 is (dim, hidden), w2 is (hidden, dim).
    w1 = jax.random.uniform(kw1, (DIM, HID), jnp.float32, -lim1, lim1)
    b1 = jax.random.uniform(kb1, (HID,), jnp.float32, -lim1, lim1)
    w2 = jax.random.uniform(kw2, (HID, DIM), jnp.float32, -lim2, lim2)
    b2 = jax.random.uniform(kb2, (DIM,), jnp.float32, -lim2, lim2)

    y = feedforward(x, w1, b1, w2, b2)
    jax.block_until_ready(y)

    # Pure-JAX reference with the FULL torch sequence (all five make_fxp calls,
    # dropout p=0.0 == identity) at matching (HIGHEST) matmul precision.
    def ref_make_fxp(v):
        v = jnp.where(v >= _LIM, _LIM, v)
        v = jnp.where(v < -_LIM, -_LIM, v)
        return jnp.trunc(v * _SCALE) * _INV_SCALE

    def ref(xin):
        h = jnp.dot(xin.reshape(-1, DIM), w1,
                    precision=lax.Precision.HIGHEST) + b1
        h = ref_make_fxp(h)
        h = 0.5 * h * (1.0 + lax.erf(h * _INV_SQRT2))
        h = ref_make_fxp(h)
        h = ref_make_fxp(h)          # drop1's make_fxp (p=0.0 identity)
        o = jnp.dot(h, w2, precision=lax.Precision.HIGHEST) + b2
        o = ref_make_fxp(o)
        o = ref_make_fxp(o)          # drop2's make_fxp (p=0.0 identity)
        return o.reshape(B, N, DIM)

    # Tolerance = one fixed-point ulp (2^-12) to absorb rare truncation-boundary
    # flips from differing-but-equivalent f32 accumulation orders.
    max_err = float(jnp.max(jnp.abs(y - ref(x))))
    assert max_err <= (2.0 ** -FRACTION_BITS) + 1e-6, f"mismatch vs reference: {max_err}"
    print("KERNEL_OK")
</pallas_src>

<mosaic_0001>
module attributes {stable_mosaic.version = 11 : i64} {
  func.func @feedforward_kernel(%arg0: i32, %arg1: memref<8x128xf32, #tpu.memory_space<vmem>>, %arg2: memref<128x128xf32, #tpu.memory_space<vmem>>, %arg3: memref<1x128xf32, #tpu.memory_space<vmem>>, %arg4: memref<128x128xf32, #tpu.memory_space<vmem>>, %arg5: memref<1x128xf32, #tpu.memory_space<vmem>>, %arg6: memref<8x128xf32, #tpu.memory_space<vmem>>) attributes {dimension_semantics = [#tpu.dimension_semantics<parallel>], iteration_bounds = array<i64: 2>, scalar_prefetch = 0 : i64, scratch_operands = 0 : i64, tpu.core_type = #tpu.core_type<tc>, window_params = [{transform_indices = @transform_0, window_bounds = array<i64: 8, 128>}, {pipeline_mode = #tpu.pipeline_mode<synchronous>, transform_indices = @transform_1, window_bounds = array<i64: 128, 128>}, {pipeline_mode = #tpu.pipeline_mode<synchronous>, transform_indices = @transform_2, window_bounds = array<i64: 1, 128>}, {pipeline_mode = #tpu.pipeline_mode<synchronous>, transform_indices = @transform_3, window_bounds = array<i64: 128, 128>}, {pipeline_mode = #tpu.pipeline_mode<synchronous>, transform_indices = @transform_4, window_bounds = array<i64: 1, 128>}, {transform_indices = @transform_5, window_bounds = array<i64: 8, 128>}]} {
    %c0 = arith.constant 0 : index
    %c0_0 = arith.constant 0 : index
    %0 = vector.load %arg1[%c0, %c0_0] : memref<8x128xf32, #tpu.memory_space<vmem>>, vector<8x128xf32>
    %c0_1 = arith.constant 0 : index
    %c0_2 = arith.constant 0 : index
    %1 = vector.load %arg2[%c0_1, %c0_2] : memref<128x128xf32, #tpu.memory_space<vmem>>, vector<128x128xf32>
    %cst = arith.constant dense<0.000000e+00> : vector<8x128xf32>
    %2 = tpu.matmul %0, %1, %cst {dimension_numbers = #tpu.dot_dimension_numbers<[1], [0], [0], [1], [0, 0, 1, 1], [], []>, precision = #tpu.contract_precision<fp32>} : vector<8x128xf32>, vector<128x128xf32>, vector<8x128xf32> -> vector<8x128xf32>
    %c0_3 = arith.constant 0 : index
    %c0_4 = arith.constant 0 : index
    %3 = vector.load %arg3[%c0_3, %c0_4] : memref<1x128xf32, #tpu.memory_space<vmem>>, vector<1x128xf32>
    %4 = vector.broadcast %3 : vector<1x128xf32> to vector<8x128xf32>
    %5 = arith.addf %2, %4 : vector<8x128xf32>
    %cst_5 = arith.constant -7.99975586 : f32
    %cst_6 = arith.constant 7.99975586 : f32
    %6 = vector.broadcast %cst_5 : f32 to vector<8x128xf32>
    %7 = arith.maximumf %6, %5 : vector<8x128xf32>
    %8 = vector.broadcast %cst_6 : f32 to vector<8x128xf32>
    %9 = arith.minimumf %8, %7 : vector<8x128xf32>
    %cst_7 = arith.constant 4.096000e+03 : f32
    %10 = vector.broadcast %cst_7 : f32 to vector<8x128xf32>
    %11 = arith.mulf %9, %10 : vector<8x128xf32>
    %12 = arith.fptosi %11 : vector<8x128xf32> to vector<8x128xi32>
    %13 = arith.sitofp %12 : vector<8x128xi32> to vector<8x128xf32>
    %cst_8 = arith.constant 2.44140625E-4 : f32
    %14 = vector.broadcast %cst_8 : f32 to vector<8x128xf32>
    %15 = arith.mulf %13, %14 : vector<8x128xf32>
    %cst_9 = arith.constant 5.000000e-01 : f32
    %16 = vector.broadcast %cst_9 : f32 to vector<8x128xf32>
    %17 = arith.mulf %16, %15 : vector<8x128xf32>
    %cst_10 = arith.constant 0.707106769 : f32
    %18 = vector.broadcast %cst_10 : f32 to vector<8x128xf32>
    %19 = arith.mulf %15, %18 : vector<8x128xf32>
    %20 = math.erf %19 : vector<8x128xf32>
    %cst_11 = arith.constant 1.000000e+00 : f32
    %21 = vector.broadcast %cst_11 : f32 to vector<8x128xf32>
    %22 = arith.addf %21, %20 : vector<8x128xf32>
    %23 = arith.mulf %17, %22 : vector<8x128xf32>
    %cst_12 = arith.constant 4.096000e+03 : f32
    %24 = vector.broadcast %cst_12 : f32 to vector<8x128xf32>
    %25 = arith.mulf %23, %24 : vector<8x128xf32>
    %26 = arith.fptosi %25 : vector<8x128xf32> to vector<8x128xi32>
    %27 = arith.sitofp %26 : vector<8x128xi32> to vector<8x128xf32>
    %cst_13 = arith.constant 2.44140625E-4 : f32
    %28 = vector.broadcast %cst_13 : f32 to vector<8x128xf32>
    %29 = arith.mulf %27, %28 : vector<8x128xf32>
    %c0_14 = arith.constant 0 : index
    %c0_15 = arith.constant 0 : index
    %30 = vector.load %arg4[%c0_14, %c0_15] : memref<128x128xf32, #tpu.memory_space<vmem>>, vector<128x128xf32>
    %cst_16 = arith.constant dense<0.000000e+00> : vector<8x128xf32>
    %31 = tpu.matmul %29, %30, %cst_16 {dimension_numbers = #tpu.dot_dimension_numbers<[1], [0], [0], [1], [0, 0, 1, 1], [], []>, precision = #tpu.contract_precision<fp32>} : vector<8x128xf32>, vector<128x128xf32>, vector<8x128xf32> -> vector<8x128xf32>
    %c0_17 = arith.constant 0 : index
    %c0_18 = arith.constant 0 : index
    %32 = vector.load %arg5[%c0_17, %c0_18] : memref<1x128xf32, #tpu.memory_space<vmem>>, vector<1x128xf32>
    %33 = vector.broadcast %32 : vector<1x128xf32> to vector<8x128xf32>
    %34 = arith.addf %31, %33 : vector<8x128xf32>
    %cst_19 = arith.constant -7.99975586 : f32
    %cst_20 = arith.constant 7.99975586 : f32
    %35 = vector.broadcast %cst_19 : f32 to vector<8x128xf32>
    %36 = arith.maximumf %35, %34 : vector<8x128xf32>
    %37 = vector.broadcast %cst_20 : f32 to vector<8x128xf32>
    %38 = arith.minimumf %37, %36 : vector<8x128xf32>
    %cst_21 = arith.constant 4.096000e+03 : f32
    %39 = vector.broadcast %cst_21 : f32 to vector<8x128xf32>
    %40 = arith.mulf %38, %39 : vector<8x128xf32>
    %41 = arith.fptosi %40 : vector<8x128xf32> to vector<8x128xi32>
    %42 = arith.sitofp %41 : vector<8x128xi32> to vector<8x128xf32>
    %cst_22 = arith.constant 2.44140625E-4 : f32
    %43 = vector.broadcast %cst_22 : f32 to vector<8x128xf32>
    %44 = arith.mulf %42, %43 : vector<8x128xf32>
    %c0_23 = arith.constant 0 : index
    %c0_24 = arith.constant 0 : index
    %45 = vector.load %arg6[%c0_23, %c0_24] : memref<8x128xf32, #tpu.memory_space<vmem>>, vector<8x128xf32>
    tpu.vector_store %arg6[%c0_23, %c0_24], %44 {strides = array<i32>} : memref<8x128xf32, #tpu.memory_space<vmem>>, vector<8x128xf32>,
    return
  }
  func.func @transform_0(%arg0: i32) -> (i32, i32) {
    %c0_i32 = arith.constant 0 : i32
    %c0_i32_0 = arith.constant 0 : i32
    return %arg0, %c0_i32 : i32, i32
  }
  func.func @transform_1(%arg0: i32) -> (i32, i32) {
    %c0_i32 = arith.constant 0 : i32
    %c0_i32_0 = arith.constant 0 : i32
    %c0_i32_1 = arith.constant 0 : i32
    return %c0_i32, %c0_i32_0 : i32, i32
  }
  func.func @transform_2(%arg0: i32) -> (i32, i32) {
    %c0_i32 = arith.constant 0 : i32
    %c0_i32_0 = arith.constant 0 : i32
    %c0_i32_1 = arith.constant 0 : i32
    return %c0_i32, %c0_i32_0 : i32, i32
  }
  func.func @transform_3(%arg0: i32) -> (i32, i32) {
    %c0_i32 = arith.constant 0 : i32
    %c0_i32_0 = arith.constant 0 : i32
    %c0_i32_1 = arith.constant 0 : i32
    return %c0_i32, %c0_i32_0 : i32, i32
  }
  func.func @transform_4(%arg0: i32) -> (i32, i32) {
    %c0_i32 = arith.constant 0 : i32
    %c0_i32_0 = arith.constant 0 : i32
    %c0_i32_1 = arith.constant 0 : i32
    return %c0_i32, %c0_i32_0 : i32, i32
  }
  func.func @transform_5(%arg0: i32) -> (i32, i32) {
    %c0_i32 = arith.constant 0 : i32
    %c0_i32_0 = arith.constant 0 : i32
    return %arg0, %c0_i32 : i32, i32
  }
}

module attributes {stable_mosaic.version = 11 : i64} {
  func.func @feedforward_kernel(%arg0: i32, %arg1: memref<8x128xf32, #tpu.memory_space<vmem>>, %arg2: memref<128x128xf32, #tpu.memory_space<vmem>>, %arg3: memref<1x128xf32, #tpu.memory_space<vmem>>, %arg4: memref<128x128xf32, #tpu.memory_space<vmem>>, %arg5: memref<1x128xf32, #tpu.memory_space<vmem>>, %arg6: memref<8x128xf32, #tpu.memory_space<vmem>>) attributes {dimension_semantics = [#tpu.dimension_semantics<parallel>], iteration_bounds = array<i64: 2>, scalar_prefetch = 0 : i64, scratch_operands = 0 : i64, tpu.core_type = #tpu.core_type<tc>, window_params = [{transform_indices = @transform_0, window_bounds = array<i64: 8, 128>}, {pipeline_mode = #tpu.pipeline_mode<synchronous>, transform_indices = @transform_1, window_bounds = array<i64: 128, 128>}, {pipeline_mode = #tpu.pipeline_mode<synchronous>, transform_indices = @transform_2, window_bounds = array<i64: 1, 128>}, {pipeline_mode = #tpu.pipeline_mode<synchronous>, transform_indices = @transform_3, window_bounds = array<i64: 128, 128>}, {pipeline_mode = #tpu.pipeline_mode<synchronous>, transform_indices = @transform_4, window_bounds = array<i64: 1, 128>}, {transform_indices = @transform_5, window_bounds = array<i64: 8, 128>}]} {
    %c0 = arith.constant 0 : index
    %c0_0 = arith.constant 0 : index
    %0 = vector.load %arg1[%c0, %c0_0] : memref<8x128xf32, #tpu.memory_space<vmem>>, vector<8x128xf32>
    %c0_1 = arith.constant 0 : index
    %c0_2 = arith.constant 0 : index
    %1 = vector.load %arg2[%c0_1, %c0_2] : memref<128x128xf32, #tpu.memory_space<vmem>>, vector<128x128xf32>
    %cst = arith.constant dense<0.000000e+00> : vector<8x128xf32>
    %2 = tpu.matmul %0, %1, %cst {dimension_numbers = #tpu.dot_dimension_numbers<[1], [0], [0], [1], [0, 0, 1, 1], [], []>, precision = #tpu.contract_precision<fp32>} : vector<8x128xf32>, vector<128x128xf32>, vector<8x128xf32> -> vector<8x128xf32>
    %c0_3 = arith.constant 0 : index
    %c0_4 = arith.constant 0 : index
    %3 = vector.load %arg3[%c0_3, %c0_4] : memref<1x128xf32, #tpu.memory_space<vmem>>, vector<1x128xf32>
    %4 = vector.broadcast %3 : vector<1x128xf32> to vector<8x128xf32>
    %5 = arith.addf %2, %4 : vector<8x128xf32>
    %cst_5 = arith.constant -7.99975586 : f32
    %cst_6 = arith.constant 7.99975586 : f32
    %6 = vector.broadcast %cst_5 : f32 to vector<8x128xf32>
    %7 = arith.maximumf %6, %5 : vector<8x128xf32>
    %8 = vector.broadcast %cst_6 : f32 to vector<8x128xf32>
    %9 = arith.minimumf %8, %7 : vector<8x128xf32>
    %cst_7 = arith.constant 4.096000e+03 : f32
    %10 = vector.broadcast %cst_7 : f32 to vector<8x128xf32>
    %11 = arith.mulf %9, %10 : vector<8x128xf32>
    %12 = arith.fptosi %11 : vector<8x128xf32> to vector<8x128xi32>
    %13 = arith.sitofp %12 : vector<8x128xi32> to vector<8x128xf32>
    %cst_8 = arith.constant 2.44140625E-4 : f32
    %14 = vector.broadcast %cst_8 : f32 to vector<8x128xf32>
    %15 = arith.mulf %13, %14 : vector<8x128xf32>
    %cst_9 = arith.constant 5.000000e-01 : f32
    %16 = vector.broadcast %cst_9 : f32 to vector<8x128xf32>
    %17 = arith.mulf %16, %15 : vector<8x128xf32>
    %cst_10 = arith.constant 0.707106769 : f32
    %18 = vector.broadcast %cst_10 : f32 to vector<8x128xf32>
    %19 = arith.mulf %15, %18 : vector<8x128xf32>
    %20 = math.erf %19 : vector<8x128xf32>
    %cst_11 = arith.constant 1.000000e+00 : f32
    %21 = vector.broadcast %cst_11 : f32 to vector<8x128xf32>
    %22 = arith.addf %21, %20 : vector<8x128xf32>
    %23 = arith.mulf %17, %22 : vector<8x128xf32>
    %cst_12 = arith.constant 4.096000e+03 : f32
    %24 = vector.broadcast %cst_12 : f32 to vector<8x128xf32>
    %25 = arith.mulf %23, %24 : vector<8x128xf32>
    %26 = arith.fptosi %25 : vector<8x128xf32> to vector<8x128xi32>
    %27 = arith.sitofp %26 : vector<8x128xi32> to vector<8x128xf32>
    %cst_13 = arith.constant 2.44140625E-4 : f32
    %28 = vector.broadcast %cst_13 : f32 to vector<8x128xf32>
    %29 = arith.mulf %27, %28 : vector<8x128xf32>
    %c0_14 = arith.constant 0 : index
    %c0_15 = arith.constant 0 : index
    %30 = vector.load %arg4[%c0_14, %c0_15] : memref<128x128xf32, #tpu.memory_space<vmem>>, vector<128x128xf32>
    %cst_16 = arith.constant dense<0.000000e+00> : vector<8x128xf32>
    %31 = tpu.matmul %29, %30, %cst_16 {dimension_numbers = #tpu.dot_dimension_numbers<[1], [0], [0], [1], [0, 0, 1, 1], [], []>, precision = #tpu.contract_precision<fp32>} : vector<8x128xf32>, vector<128x128xf32>, vector<8x128xf32> -> vector<8x128xf32>
    %c0_17 = arith.constant 0 : index
    %c0_18 = arith.constant 0 : index
    %32 = vector.load %arg5[%c0_17, %c0_18] : memref<1x128xf32, #tpu.memory_space<vmem>>, vector<1x128xf32>
    %33 = vector.broadcast %32 : vector<1x128xf32> to vector<8x128xf32>
    %34 = arith.addf %31, %33 : vector<8x128xf32>
    %cst_19 = arith.constant -7.99975586 : f32
    %cst_20 = arith.constant 7.99975586 : f32
    %35 = vector.broadcast %cst_19 : f32 to vector<8x128xf32>
    %36 = arith.maximumf %35, %34 : vector<8x128xf32>
    %37 = vector.broadcast %cst_20 : f32 to vector<8x128xf32>
    %38 = arith.minimumf %37, %36 : vector<8x128xf32>
    %cst_21 = arith.constant 4.096000e+03 : f32
    %39 = vector.broadcast %cst_21 : f32 to vector<8x128xf32>
    %40 = arith.mulf %38, %39 : vector<8x128xf32>
    %41 = arith.fptosi %40 : vector<8x128xf32> to vector<8x128xi32>
    %42 = arith.sitofp %41 : vector<8x128xi32> to vector<8x128xf32>
    %cst_22 = arith.constant 2.44140625E-4 : f32
    %43 = vector.broadcast %cst_22 : f32 to vector<8x128xf32>
    %44 = arith.mulf %42, %43 : vector<8x128xf32>
    %c0_23 = arith.constant 0 : index
    %c0_24 = arith.constant 0 : index
    %45 = vector.load %arg6[%c0_23, %c0_24] : memref<8x128xf32, #tpu.memory_space<vmem>>, vector<8x128xf32>
    tpu.vector_store %arg6[%c0_23, %c0_24], %44 {strides = array<i32>} : memref<8x128xf32, #tpu.memory_space<vmem>>, vector<8x128xf32>,
    return
  }
  func.func @transform_0(%arg0: i32) -> (i32, i32) {
    %c0_i32 = arith.constant 0 : i32
    %c0_i32_0 = arith.constant 0 : i32
    return %arg0, %c0_i32 : i32, i32
  }
  func.func @transform_1(%arg0: i32) -> (i32, i32) {
    %c0_i32 = arith.constant 0 : i32
    %c0_i32_0 = arith.constant 0 : i32
    %c0_i32_1 = arith.constant 0 : i32
    return %c0_i32, %c0_i32_0 : i32, i32
  }
  func.func @transform_2(%arg0: i32) -> (i32, i32) {
    %c0_i32 = arith.constant 0 : i32
    %c0_i32_0 = arith.constant 0 : i32
    %c0_i32_1 = arith.constant 0 : i32
    return %c0_i32, %c0_i32_0 : i32, i32
  }
  func.func @transform_3(%arg0: i32) -> (i32, i32) {
    %c0_i32 = arith.constant 0 : i32
    %c0_i32_0 = arith.constant 0 : i32
    %c0_i32_1 = arith.constant 0 : i32
    return %c0_i32, %c0_i32_0 : i32, i32
  }
  func.func @transform_4(%arg0: i32) -> (i32, i32) {
    %c0_i32 = arith.constant 0 : i32
    %c0_i32_0 = arith.constant 0 : i32
    %c0_i32_1 = arith.constant 0 : i32
    return %c0_i32, %c0_i32_0 : i32, i32
  }
  func.func @transform_5(%arg0: i32) -> (i32, i32) {
    %c0_i32 = arith.constant 0 : i32
    %c0_i32_0 = arith.constant 0 : i32
    return %arg0, %c0_i32 : i32, i32
  }
}

</mosaic_0001>

<bundles_post_ra>
// kernel: tpu_custom_call.1
= control target key start
LH: loop header
LB: loop body
LE: loop exit
PB: predicated region body
PF: predicated region fallthrough
CT: control target
= control target key end

     0   :  { %10 = vsyncpa [#allocation3], 0  ;;  %s3680_s0 = inlined_call_operand.hbm [shape: f32[16,128], index: 0, kind: input, shape index: {}]   ;;  %s3681_s1 = inlined_call_operand.hbm [shape: f32[128,128], index: 1, kind: input, shape index: {}]   ;;  %s3682_s2 = inlined_call_operand.vmem [shape: f32[1,128], index: 2, kind: input, shape index: {}]   ;;  %s3683_s3 = inlined_call_operand.hbm [shape: f32[128,128], index: 3, kind: input, shape index: {}]   ;;  %s3684_s4 = inlined_call_operand.vmem [shape: f32[1,128], index: 4, kind: input, shape index: {}]   ;;  %s3685_s5 = inlined_call_operand.hbm [shape: f32[16,128], index: 5, kind: output, shape index: {}]  }
   0x1   :  { %12 = vsyncpa [#allocation3 + $0x1], 0 }
   0x2   :  { %13 = vsyncpa [#allocation6], 0 }
   0x3   :  { %14 = vsyncpa [#allocation4], 0 }
   0x4   :  { %16 = vsyncpa [#allocation4 + $0x1], 0  ;;  %s2954_s18 = smov 0   ;;  %s2956_s19 = smov 0  }
   0x5   :  { %s2958_s20 = smov 0   ;;  %s2960_s21 = smov 0  }
   0x6 LB: > { %s2975_s22 = sadd.s32 4294967295, %s2913_s21   ;;  %s1723_s23 = sadd.s32 4294967294, %s2913_s21   ;;  %s2913_s21 = sphi %s2960_s21, %s3735_s21   ;;  %s2909_s20 = sphi %s2958_s20, %s3734_s20   ;;  %s2905_s19 = sphi %s2956_s19, %s3733_s19   ;;  %s2901_s18 = sphi %s2954_s18, %s3732_s18  }
   0x7   : > { %p42_p0 = scmp.ne.s32.totalorder %s2905_s19, %s2901_s18  ;;  %p3686_p1 = scmp.eq.s32.totalorder %s2975_s22, 0 }
   0x8   : > { %p156_p3 = scmp.eq.s32.totalorder %s1723_s23, 1  ;;  %p1724_p5 = scmp.ge.s32.totalorder %s2913_s21, 1 }
   0x9   : > { %p2984_p4 = por %p3686_p1, %p42_p0  ;;  %p163_p7 = scmp.lt.s32.totalorder %s2913_s21, 3 }
   0xa   : > { %p2989_p6 = por %p156_p3, %p42_p0  ;;  %s2915_s27 = smov [#allocation5]  }
   0xb   : > { %s3704_s24 = scalar_select %p2984_p4, 1, 0 }
   0xc   : > { %s3705_s25 = scalar_select %p2989_p6, 1, 0 }
   0xd   : > { %p2994_p8 = pnand %p1724_p5, %p163_p7  ;;  %s175_s28 = sshll.u32 %s2915_s27, 4  ;;  %s2998_s28 = int_to_ptr.vmem [resolvable:$true] %s175_s28 }
   0xe   : > { %s2916_s30 = smov [#allocation7]   ;;  %s2757_s9 = scalar_lea.hbm %s3681_s1, 2048 }
   0xf   : > { %p2695_p9 = pneg %p2994_p8  ;;  %s191_s6 = sshll.u32 %s2916_s30, 4  ;;  %s3009_s6 = int_to_ptr.vmem [resolvable:$true] %s191_s6 }
  0x10   : > { %p2758_p12 = scmp.ne.s32.totalorder %s3681_s1, %s2757_s9  ;;  %p2764_p5 = scmp.lt.u32.totalorder %s2757_s9, %s3681_s1 }
  0x11   : > { %p3005_p11 = pnand %p2695_p9, %p3686_p1 }
  0x13   : > { %p2759_p13 = pneg %p3005_p11 }
  0x15   : > { %p2760_p0 = pnand %p2759_p13, %p2758_p12 }
  0x17   : > { %p2761_p3 = pneg %p2760_p0 }
  0x19   : > { %p2766_p7 = pnand %p2764_p5, %p2761_p3 }
  0x1b   : > { %2769 = shalt.err (!%p2766_p7)
}
  0x1c   : > { %s2770_s14 = scalar_lea.vmem %s2998_s28, 2048  ;;  %p2778_p2 = scmp.lt.s32.totalorder %s2998_s28, %s2998_s28 }
  0x1d   : > { %p2771_p9 = scmp.ne.s32.totalorder %s2998_s28, %s2770_s14  ;;  %p2779_p12 = scmp.lt.s32.totalorder %s2770_s14, %s2770_s14 }
  0x1f   : > { %p2773_p10 = pnand %p2771_p9, %p2759_p13  ;;  %p2780_p0 = por %p2779_p12, %p2778_p2 }
  0x21   : > { %p2774_p1 = pneg %p2773_p10 }
  0x23   : > { %p2781_p6 = pnand %p2780_p0, %p2774_p1 }
  0x25   : > { %2784 = shalt.err (!%p2781_p6)
}
  0x26   : > { %s2917_s15 = smov 128   ;;  %s2918_s16 = smov 8  }
  0x27   : > { %2698 = dma.hbm_to_vmem [thread:$0]  (!%p3005_p11), %s3681_s1, 2048, %s2998_s28, [#allocation6], %s2917_s15, %s2917_s15, %s2918_s16  }
  0x28   : > { %s2785_s7 = scalar_lea.hbm %s3683_s3, 2048 }
  0x29   : > { %p2786_p2 = scmp.ne.s32.totalorder %s3683_s3, %s2785_s7  ;;  %p2792_p10 = scmp.lt.u32.totalorder %s2785_s7, %s3683_s3 }
  0x2b   : > { %p2788_p1 = pnand %p2786_p2, %p2759_p13 }
  0x2d   : > { %p2789_p6 = pneg %p2788_p1 }
  0x2f   : > { %p2794_p3 = pnand %p2792_p10, %p2789_p6 }
  0x31   : > { %2797 = shalt.err (!%p2794_p3)
}
  0x32   : > { %s2798_s28 = scalar_lea.vmem %s3009_s6, 2048  ;;  %p2806_p12 = scmp.lt.s32.totalorder %s3009_s6, %s3009_s6 }
  0x33   : > { %p2799_p5 = scmp.ne.s32.totalorder %s3009_s6, %s2798_s28  ;;  %p2807_p0 = scmp.lt.s32.totalorder %s2798_s28, %s2798_s28 }
  0x35   : > { %p2801_p7 = pnand %p2799_p5, %p2759_p13  ;;  %p2808_p2 = por %p2807_p0, %p2806_p12 }
  0x37   : > { %p2802_p9 = pneg %p2801_p7 }
  0x39   : > { %p2809_p1 = pnand %p2808_p2, %p2802_p9 }
  0x3b   : > { %2812 = shalt.err (!%p2809_p1)
}
  0x3c   : > { %2701 = dma.hbm_to_vmem [thread:$0]  (!%p3005_p11), %s3683_s3, 2048, %s3009_s6, [#allocation6], %s2917_s15, %s2917_s15, %s2918_s16  }
  0x3d   : > { %s3064_s14 = sadd.s32 1, %s2913_s21   ;;  %s29_s29 = sadd.s32 1, %s2909_s20 }
  0x3e   : > { %s26_s17 = ssub.s32 %s2913_s21, %s3064_s14  ;;  %p36_p13 = scmp.ne.s32.totalorder %s2909_s20, %s2905_s19 }
  0x3f   : > { %p27_p6 = scmp.eq.s32.totalorder %s26_s17, 0  ;;  %p37_p10 = scmp.eq.s32.totalorder %s2913_s21, 0 }
  0x40   : > { %p3708_p3 = scmp.eq.s32.totalorder %s2975_s22, 1  ;;  %p2712_p7 = scmp.lt.s32.totalorder %s2913_s21, 2 }
  0x41   : > { %s3080_s27 = scalar_select %p27_p6, %s2909_s20, %s29_s29  }
  0x42   : > { %p3074_p5 = por %p3708_p3, %p36_p13  ;;  %p38_p9 = por %p37_p10, %p36_p13 }
  0x43   : > { %s208_s30 = sand.u32 1, %s2909_s20   ;;  %s1729_s6 = sshll.u32 %s2913_s21, 7 }
  0x44   : > { %s3709_s23 = scalar_select %p3074_p5, 1, 0 }
  0x45   : > { %s1728_s7 = sshll.u32 %s208_s30, 3  ;;  %s3087_s8 = scalar_lea.hbm %s3680_s0, %s1729_s6 }
  0x46   : > { %s212_s9 = scalar_lea.vmem [#allocation2], %s1728_s7  ;;  %p3091_p11 = pnand %p2712_p7, %p38_p9 }
  0x47   : > { %s219_s10 = sshll.u32 %s212_s9, 4  ;;  %s209_s28 = scalar_lea.sflag [#allocation3], %s208_s30  ;;  %s3089_s10 = int_to_ptr.vmem [resolvable:$true] %s219_s10 }
  0x48   : > { %s2813_s12 = scalar_lea.hbm %s3087_s8, 128  ;;  %p2815_p0 = pneg %p3091_p11 }
  0x49   : > { %p2814_p12 = scmp.ne.s32.totalorder %s3087_s8, %s2813_s12  ;;  %s2818_s17 = scalar_lea.hbm %s3680_s0, 256 }
  0x4a   : > { %p2819_p13 = scmp.lt.u32.totalorder %s3087_s8, %s3680_s0  ;;  %p2820_p6 = scmp.lt.u32.totalorder %s2818_s17, %s2813_s12 }
  0x4b   : > { %p2816_p2 = pnand %p2815_p0, %p2814_p12  ;;  %p2822_p3 = scmp.lt.u32.totalorder %s2813_s12, %s3087_s8 }
  0x4c   : > { %p2821_p10 = por %p2820_p6, %p2819_p13 }
  0x4d   : > { %p2817_p1 = pneg %p2816_p2 }
  0x4e   : > { %p2823_p7 = por %p2822_p3, %p2821_p10 }
  0x50   : > { %p2824_p9 = pnand %p2823_p7, %p2817_p1 }
  0x52   : > { %2827 = shalt.err (!%p2824_p9)
}
  0x53   : > { %s2828_s30 = scalar_lea.vmem %s3089_s10, 128  ;;  %s2919_s15 = smov [#allocation2]  }
  0x54   : > { %p2829_p12 = scmp.ne.s32.totalorder %s3089_s10, %s2828_s30  ;;  %s2833_s16 = sshll.u32 %s2919_s15, 4  ;;  %s2834_s16 = int_to_ptr.vmem [resolvable:$false] %s2833_s16 }
  0x55   : > { %s2835_s9 = scalar_lea.vmem %s2834_s16, 256  ;;  %p2836_p4 = scmp.lt.s32.totalorder %s3089_s10, %s2834_s16 }
  0x56   : > { %p2831_p2 = pnand %p2829_p12, %p2815_p0  ;;  %p2837_p13 = scmp.lt.s32.totalorder %s2835_s9, %s2828_s30 }
  0x58   : > { %p2832_p5 = pneg %p2831_p2  ;;  %p2838_p6 = por %p2837_p13, %p2836_p4 }
  0x5a   : > { %p2839_p10 = pnand %p2838_p6, %p2832_p5 }
  0x5c   : > { %2842 = shalt.err (!%p2839_p10)
}
  0x5d   : > { %2705 = dma.hbm_to_vmem [thread:$0]  (!%p3091_p11), %s3087_s8, 128, %s3089_s10, %s209_s28  }
  0x5e   : > { %228 = sbr.rel (%p2994_p8) target bundleno = 964 (0x3c4), region = 40  ;;  %s3123_s12 = sand.u32 (!%p2994_p8), 1, %s2905_s19  }
  0x5f   : > { %s1731_s13 = sshll.u32 (!%p2994_p8), %s3123_s12, 3  ;;  %s231_s29 = scalar_lea.sflag (!%p2994_p8), [#allocation3], %s3123_s12 }
  0x60   : > { %s3129_s17 = scalar_lea.vmem (!%p2994_p8), [#allocation2], %s1731_s13  ;;  %p3711_p4 = scmp.ne.s32.totalorder (!%p2994_p8), %s3704_s24, 0 }
  0x65   : > { %2888 = dma.done.wait (%p3711_p4), %s231_s29, 128  }
  0x66   : > { %2890 = vsyncadd (%p3711_p4), %s231_s29, 4294967168  ;;  %p3712_p5 = scmp.eq.s32.totalorder %s2975_s22, 0 }
  0x68   : > { %2892 = dma.done.wait (%p3712_p5), [#allocation6], 4096   ;;  %p3713_p8 = pmov %p3712_p5 }
  0x69   : > { %v2920_v0 = vmov 0.0|0.0   ;;  %vm2921_vm0 = vmmov 0   ;;  %v2922_v1 = vmov 0.0   ;;  %v270_v2 = vld [vmem:[#allocation5] sm:$0xff]  ;;  %v271_v3 = vld [vmem:[#allocation5 + $0x8] sm:$0xff]  ;;  %v272_v4 = vld [vmem:[#allocation5 + $0x10] sm:$0xff] }
  0x6a   : > { %2894 = vsyncadd (%p3713_p8), [#allocation6], 4294963200  ;;  %2367 = vmatprep.subr.bf16.mxu0 %v2920_v0  ;;  %1979 = vmatprep.mubr.msk.f32.mxu0 %vm2921_vm0, %v2922_v1  ;;  %v294_v5 = vand.u32 4294901760, %v270_v2  ;;  %v297_v6 = vand.u32 4294901760, %v271_v3  ;;  %v273_v7 = vld [vmem:[#allocation5 + $0x18] sm:$0xff]  ;;  %v300_v8 = vand.u32 4294901760, %v272_v4 }
  0x6b   : > { %2511 = vmatprep.subr.bf16.mxu1 %v2920_v0  ;;  %2189 = vmatprep.mubr.msk.f32.mxu1 %vm2921_vm0, %v2922_v1  ;;  %v303_v9 = vand.u32 4294901760, %v273_v7  ;;  %v274_v10 = vld [vmem:[#allocation5 + $0x20] sm:$0xff]  ;;  %v275_v11 = vld [vmem:[#allocation5 + $0x28] sm:$0xff]  ;;  %v276_v16 = vld [vmem:[#allocation5 + $0x30] sm:$0xff]  ;;  %s1740_s11 = sshll.u32 %s2975_s22, 7  ;;  %s268_s28 = scalar_lea.vmem [#allocation8], %s1731_s13 }
  0x6c   : > { %v3145_v12 = vpack.c.bf16 %v297_v6, %v294_v5  ;;  %v306_v14 = vand.u32 4294901760, %v274_v10  ;;  %v309_v15 = vand.u32 4294901760, %v275_v11  ;;  %v277_v17 = vld [vmem:[#allocation5 + $0x38] sm:$0xff]  ;;  %v312_v19 = vand.u32 4294901760, %v276_v16  ;;  %v278_v21 = vld [vmem:[#allocation5 + $0x40] sm:$0xff]  ;;  %v279_v22 = vld [vmem:[#allocation5 + $0x48] sm:$0xff]  ;;  %s3636_s15 = scalar_lea.hbm %s3685_s5, %s1740_s11 }
  0x6d   : > { %v3148_v13 = vpack.c.bf16 %v303_v9, %v300_v8  ;;  %v315_v20 = vand.u32 4294901760, %v277_v17  ;;  %v269_v23 = vld [vmem:[%s3129_s17] sm:$0xff]  ;;  %v3156_v24 = vsub.f32 %v270_v2, %v294_v5  ;;  %v3158_v25 = vsub.f32 %v271_v3, %v297_v6  ;;  %v282_v32 = vld [vmem:[#allocation5 + $0x60] sm:$0xff]  ;;  %v283_v35 = vld [vmem:[#allocation5 + $0x68] sm:$0xff]  ;;  %s1634_s7 = sshll.u32 %s268_s28, 4  ;;  %s1621_s16 = scalar_lea.sflag [#allocation4], %s3123_s12  ;;  %s3638_s7 = int_to_ptr.vmem [resolvable:$true] %s1634_s7 }
  0x6e   : > { %2369 = vmatpush3.bf16.msra.mxu0 %v3145_v12  ;;  %v3152_v18 = vpack.c.bf16 %v309_v15, %v306_v14  ;;  %v318_v27 = vand.u32 4294901760, %v278_v21  ;;  %v321_v28 = vand.u32 4294901760, %v279_v22  ;;  %v280_v29 = vld [vmem:[#allocation5 + $0x50] sm:$0xff]  ;;  %v281_v30 = vld [vmem:[#allocation5 + $0x58] sm:$0xff]  ;;  %v3164_v31 = vand.u32 4294901760, %v269_v23  ;;  %s2843_s9 = scalar_lea.vmem %s3638_s7, 128 }
  0x6f   : > { %2370 = vmatprep.subr.bf16.mxu0 %v2920_v0  ;;  %v3161_v26 = vpack.c.bf16 %v315_v20, %v312_v19  ;;  %v3166_v33 = vsub.f32 %v272_v4, %v300_v8  ;;  %v324_v34 = vand.u32 4294901760, %v280_v29  ;;  %v284_v36 = vld [vmem:[#allocation5 + $0x70] sm:$0xff]  ;;  %v285_v37 = vld [vmem:[#allocation5 + $0x78] sm:$0xff]  ;;  %v327_v39 = vand.u32 4294901760, %v281_v30  ;;  %p2844_p11 = scmp.ne.s32.totalorder %s3638_s7, %s2843_s9  ;;  %p3729_p0 = scmp.ne.s32.totalorder %s3709_s23, 0 }
  0x70   : > { %v3169_v38 = vpack.c.bf16 %v321_v28, %v318_v27  ;;  %v387_v40 = vand.u32 4294901760, %v3156_v24  ;;  %v394_v41 = vand.u32 4294901760, %v3158_v25  ;;  %v3173_v42 = vsub.f32 %v273_v7, %v303_v9  ;;  %s2923_s22 = smov [#allocation8]  }
  0x71   : > { %v3175_v43 = vsub.f32 %v274_v10, %v306_v14  ;;  %v3177_v44 = vsub.f32 %v275_v11, %v309_v15  ;;  %v3181_v45 = vsub.f32 %v269_v23, %v3164_v31  ;;  %v330_v46 = vand.u32 4294901760, %v282_v32  ;;  %p2845_p1 = pnand %p2844_p11, %p3729_p0  ;;  %s2847_s13 = sshll.u32 %s2923_s22, 4  ;;  %s2848_s13 = int_to_ptr.vmem [resolvable:$false] %s2847_s13 }
  0x72   : > { %2372 = vmatpush3.bf16.msra.mxu0 %v3148_v13  ;;  %v333_v47 = vand.u32 4294901760, %v283_v35  ;;  %v336_v48 = vand.u32 4294901760, %v284_v36  ;;  %v339_v49 = vand.u32 4294901760, %v285_v37  ;;  %v3183_v50 = vsub.f32 %v276_v16, %v312_v19  ;;  %s2849_s29 = scalar_lea.vmem %s2848_s13, 256  ;;  %p2850_p7 = scmp.lt.s32.totalorder %s3638_s7, %s2848_s13 }
  0x73   : > { %2373 = vmatprep.subr.bf16.mxu0 %v2920_v0  ;;  %v3185_v51 = vsub.f32 %v277_v17, %v315_v20  ;;  %v3187_v52 = vsub.f32 %v278_v21, %v318_v27  ;;  %v401_v53 = vand.u32 4294901760, %v3166_v33  ;;  %v3191_v54 = vsub.f32 %v279_v22, %v321_v28  ;;  %p2846_p3 = pneg %p2845_p1  ;;  %p2851_p9 = scmp.lt.s32.totalorder %s2849_s29, %s2843_s9 }
  0x74   : > { %v3193_v55 = vpack.c.bf16 %v327_v39, %v324_v34  ;;  %v388_v56 = vsub.f32 %v3156_v24, %v387_v40  ;;  %v395_v57 = vsub.f32 %v3158_v25, %v394_v41  ;;  %v3198_v58 = vsub.f32 %v280_v29, %v324_v34 }
  0x75   : > { %v3200_v59 = vsub.f32 %v281_v30, %v327_v39  ;;  %v3202_v60 = vsub.f32 %v282_v32, %v330_v46  ;;  %v376_v61 = vand.u32 4294901760, %v3181_v45  ;;  %v3205_v62 = vpack.c.bf16 %v333_v47, %v330_v46  ;;  %p2852_p12 = por %p2851_p9, %p2850_p7 }
  0x76   : > { %2375 = vmatpush3.bf16.msra.mxu0 %v3152_v18  ;;  %v3207_v63 = vsub.f32 %v283_v35, %v333_v47  ;;  %v3209_v2 = vpack.c.bf16 %v339_v49, %v336_v48  ;;  %v3211_v3 = vsub.f32 %v284_v36, %v336_v48  ;;  %v3213_v4 = vsub.f32 %v285_v37, %v339_v49 }
  0x77   : > { %2376 = vmatprep.subr.bf16.mxu0 %v2920_v0  ;;  %v402_v5 = vsub.f32 %v3166_v33, %v401_v53  ;;  %v408_v6 = vand.u32 4294901760, %v3173_v42  ;;  %v415_v7 = vand.u32 4294901760, %v3175_v43  ;;  %v389_v8 = vand.u32 4294901760, %v388_v56  ;;  %p2853_p2 = pnand %p2852_p12, %p2846_p3 }
  0x78   : > { %v396_v9 = vand.u32 4294901760, %v395_v57  ;;  %v422_v10 = vand.u32 4294901760, %v3177_v44  ;;  %v429_v11 = vand.u32 4294901760, %v3183_v50  ;;  %v377_v14 = vsub.f32 %v3181_v45, %v376_v61 }
  0x79   : > { %v436_v15 = vand.u32 4294901760, %v3185_v51  ;;  %v443_v16 = vand.u32 4294901760, %v3187_v52  ;;  %v450_v17 = vand.u32 4294901760, %v3191_v54  ;;  %v457_v19 = vand.u32 4294901760, %v3198_v58 }
  0x7a   : > { %2378 = vmatpush3.bf16.msra.mxu0 %v3161_v26  ;;  %v464_v20 = vand.u32 4294901760, %v3200_v59  ;;  %v471_v21 = vand.u32 4294901760, %v3202_v60  ;;  %v478_v22 = vand.u32 4294901760, %v3207_v63  ;;  %v485_v23 = vand.u32 4294901760, %v3211_v3 }
  0x7b   : > { %2379 = vmatprep.subr.bf16.mxu0 %v2920_v0  ;;  %v492_v27 = vand.u32 4294901760, %v3213_v4  ;;  %v3234_v28 = vpack.c.bf16 %v394_v41, %v387_v40  ;;  %v3236_v29 = vpack.c.bf16 %v408_v6, %v401_v53  ;;  %v409_v30 = vsub.f32 %v3173_v42, %v408_v6 }
  0x7c   : > { %v3240_v32 = vpack.c.bf16 %v422_v10, %v415_v7  ;;  %v3242_v34 = vpack.c.bf16 %v436_v15, %v429_v11  ;;  %v3244_v35 = vpack.c.bf16 %v450_v17, %v443_v16  ;;  %v3247_v36 = vpack.c.bf16 %v464_v20, %v457_v19 }
  0x7d   : > { %v3249_v37 = vpack.c.bf16 %v478_v22, %v471_v21  ;;  %v3251_v39 = vpack.c.bf16 %v492_v27, %v485_v23  ;;  %v378_v40 = vand.u32 4294901760, %v377_v14  ;;  %v403_v41 = vand.u32 4294901760, %v402_v5 }
  0x7e   : > { %2381 = vmatpush3.bf16.msra.mxu0 %v3169_v38  ;;  %v2392_v46 = vpack.c.bf16 %v396_v9, %v389_v8  ;;  %v410_v47 = vand.u32 4294901760, %v409_v30  ;;  %v416_v48 = vsub.f32 %v3175_v43, %v415_v7  ;;  %v423_v49 = vsub.f32 %v3177_v44, %v422_v10 }
  0x7f   : > { %2382 = vmatprep.subr.bf16.mxu0 %v2920_v0  ;;  %v430_v53 = vsub.f32 %v3183_v50, %v429_v11  ;;  %v437_v14 = vsub.f32 %v3185_v51, %v436_v15  ;;  %v444_v5 = vsub.f32 %v3187_v52, %v443_v16  ;;  %v451_v10 = vsub.f32 %v3191_v54, %v450_v17 }
  0x80   : > { %v2395_v56 = vpack.c.bf16 %v410_v47, %v403_v41  ;;  %v417_v57 = vand.u32 4294901760, %v416_v48  ;;  %v424_v6 = vand.u32 4294901760, %v423_v49  ;;  %v458_v15 = vsub.f32 %v3198_v58, %v457_v19 }
  0x81   : > { %v431_v8 = vand.u32 4294901760, %v430_v53  ;;  %v438_v9 = vand.u32 4294901760, %v437_v14  ;;  %v445_v11 = vand.u32 4294901760, %v444_v5  ;;  %v465_v41 = vsub.f32 %v3200_v59, %v464_v20  ;;  %v961_v5 = vld [vmem:[#allocation7 + $0x60] sm:$0xff] }
  0x82   : > { %2384 = vmatpush3.bf16.msra.mxu0 %v3193_v55  ;;  %v2398_v7 = vpack.c.bf16 %v424_v6, %v417_v57  ;;  %v472_v16 = vsub.f32 %v3202_v60, %v471_v21  ;;  %v459_v47 = vand.u32 4294901760, %v458_v15  ;;  %v479_v17 = vsub.f32 %v3207_v63, %v478_v22  ;;  %v963_v15 = vld [vmem:[#allocation7 + $0x70] sm:$0xff] }
  0x83   : > { %2385 = vmatprep.subr.bf16.mxu0 %v2920_v0  ;;  %v2401_v30 = vpack.c.bf16 %v438_v9, %v431_v8  ;;  %v466_v48 = vand.u32 4294901760, %v465_v41  ;;  %v486_v19 = vsub.f32 %v3211_v3, %v485_v23  ;;  %v493_v20 = vsub.f32 %v3213_v4, %v492_v27 }
  0x84   : > { %v473_v49 = vand.u32 4294901760, %v472_v16  ;;  %v2416_v14 = vpack.c.bf16 %v3158_v25, %v3156_v24  ;;  %v2419_v23 = vpack.c.bf16 %v3173_v42, %v3166_v33  ;;  %v2422_v27 = vpack.c.bf16 %v3177_v44, %v3175_v43 }
  0x85   : > { %v2407_v53 = vpack.c.bf16 %v466_v48, %v459_v47  ;;  %v487_v57 = vand.u32 4294901760, %v486_v19  ;;  %v494_v6 = vand.u32 4294901760, %v493_v20  ;;  %v2425_v24 = vpack.c.bf16 %v3185_v51, %v3183_v50  ;;  %v964_v48 = vld [vmem:[#allocation7 + $0x78] sm:$0xff] }
  0x86   : > { %2387 = vmatpush3.bf16.msra.mxu0 %v3205_v62  ;;  %v2428_v25 = vpack.c.bf16 %v3191_v54, %v3187_v52  ;;  %v2431_v33 = vpack.c.bf16 %v3200_v59, %v3198_v58  ;;  %v2434_v42 = vpack.c.bf16 %v3207_v63, %v3202_v60  ;;  %v2437_v43 = vpack.c.bf16 %v3213_v4, %v3211_v3  ;;  %v953_v54 = vld [vmem:[#allocation7 + $0x20] sm:$0xff]  ;;  %v955_v60 = vld [vmem:[#allocation7 + $0x30] sm:$0xff]  ;;  %v958_v4 = vld [vmem:[#allocation7 + $0x48] sm:$0xff] }
  0x87   : > { %2388 = vmatprep.subr.bf16.mxu0 %v2920_v0  ;;  %v2413_v22 = vpack.c.bf16 %v494_v6, %v487_v57  ;;  %v957_v3 = vld [vmem:[#allocation7 + $0x40] sm:$0xff]  ;;  %v1009_v8 = vand.u32 4294901760, %v961_v5  ;;  %v1015_v57 = vand.u32 4294901760, %v963_v15  ;;  %v1018_v6 = vand.u32 4294901760, %v964_v48 }
  0x89   : > { %v3412_v20 = vsub.f32 %v961_v5, %v1009_v8 }
  0x8a   : > { %2390 = vmatpush3.bf16.msra.mxu0 %v3209_v2 }
  0x8b   : > { %2391 = vmatprep.subr.bf16.mxu0 %v2920_v0 }
  0x8d   : > { %1980 = vmatmul.mubr.f32.vlgmr.msra.gmra.mrb[0].mxu0 %v378_v40  ;;  %v452_v40 = vand.u32 4294901760, %v451_v10 }
  0x8e   : > { %2393 = vmatpush3.bf16.msra.mxu0 %v2392_v46  ;;  %2014 = vmatprep.mubr.msk.f32.mxu0 %vm2921_vm0, %v2922_v1 }
  0x8f   : > { %2394 = vmatprep.subr.bf16.mxu0 %v2920_v0  ;;  %v2404_v46 = vpack.c.bf16 %v452_v40, %v445_v11 }
  0x92   : > { %2396 = vmatpush3.bf16.msra.mxu0 %v2395_v56  ;;  %v480_v56 = vand.u32 4294901760, %v479_v17 }
  0x93   : > { %2397 = vmatprep.subr.bf16.mxu0 %v2920_v0 }
  0x94   : > { %v2410_v21 = vpack.c.bf16 %v480_v56, %v473_v49 }
  0x96   : > { %2399 = vmatpush3.bf16.msra.mxu0 %v2398_v7  ;;  %v962_v7 = vld [vmem:[#allocation7 + $0x68] sm:$0xff] }
  0x97   : > { %2400 = vmatprep.subr.bf16.mxu0 %v2920_v0  ;;  %v1012_v9 = vand.u32 4294901760, %v962_v7 }
  0x99   : > { %v3410_v19 = vpack.c.bf16 %v1012_v9, %v1009_v8 }
  0x9a   : > { %2402 = vmatpush3.bf16.msra.mxu0 %v2401_v30 }
  0x9b   : > { %2403 = vmatprep.subr.bf16.mxu0 %v2920_v0 }
  0x9e   : > { %2405 = vmatpush3.bf16.msra.mxu0 %v2404_v46 }
  0x9f   : > { %2406 = vmatprep.subr.bf16.mxu0 %v2920_v0 }
  0xa2   : > { %2408 = vmatpush3.bf16.msra.mxu0 %v2407_v53 }
  0xa3   : > { %2409 = vmatprep.subr.bf16.mxu0 %v2920_v0 }
  0xa6   : > { %2411 = vmatpush3.bf16.msra.mxu0 %v2410_v21  ;;  %v3414_v21 = vsub.f32 %v962_v7, %v1012_v9 }
  0xa7   : > { %2412 = vmatprep.subr.bf16.mxu0 %v2920_v0 }
  0xaa   : > { %2414 = vmatpush3.bf16.msra.mxu0 %v2413_v22 }
  0xab   : > { %2415 = vmatprep.subr.bf16.mxu0 %v2920_v0 }
  0xad   : > { %2015 = vmatmul.mubr.f32.vlgmr.msra.gmra.mrb[0].mxu0 %v3164_v31 }
  0xae   : > { %2417 = vmatpush3.bf16.msra.mxu0 %v2416_v14  ;;  %2049 = vmatprep.mubr.msk.f32.mxu0 %vm2921_vm0, %v2922_v1 }
  0xaf   : > { %2418 = vmatprep.subr.bf16.mxu0 %v2920_v0 }
  0xb2   : > { %2420 = vmatpush3.bf16.msra.mxu0 %v2419_v23  ;;  %v3419_v23 = vsub.f32 %v963_v15, %v1015_v57 }
  0xb3   : > { %2421 = vmatprep.subr.bf16.mxu0 %v2920_v0 }
  0xb6   : > { %2423 = vmatpush3.bf16.msra.mxu0 %v2422_v27  ;;  %v3422_v27 = vpack.c.bf16 %v1018_v6, %v1015_v57 }
  0xb7   : > { %2424 = vmatprep.subr.bf16.mxu0 %v2920_v0 }
  0xba   : > { %2426 = vmatpush3.bf16.msra.mxu0 %v2425_v24  ;;  %v3424_v24 = vsub.f32 %v964_v48, %v1018_v6 }
  0xbb   : > { %2427 = vmatprep.subr.bf16.mxu0 %v2920_v0 }
  0xbe   : > { %2429 = vmatpush3.bf16.msra.mxu0 %v2428_v25 }
  0xbf   : > { %2430 = vmatprep.subr.bf16.mxu0 %v2920_v0 }
  0xc2   : > { %2432 = vmatpush3.bf16.msra.mxu0 %v2431_v33 }
  0xc3   : > { %2433 = vmatprep.subr.bf16.mxu0 %v2920_v0 }
  0xc6   : > { %2435 = vmatpush3.bf16.msra.mxu0 %v2434_v42 }
  0xc7   : > { %2436 = vmatprep.subr.bf16.mxu0 %v2920_v0 }
  0xca   : > { %2438 = vmatpush3.bf16.msra.mxu0 %v2437_v43 }
  0xcb   : > { %2439 = vmatprep.subr.bf16.mxu0 %v2920_v0 }
  0xcd   : > { %2050 = vmatmul.mubr.f32.vlgmr.msra.gmra.mrb[0].mxu0 %v3181_v45  ;;  %v952_v45 = vld [vmem:[#allocation7 + $0x18] sm:$0xff] }
  0xce   : > { %2441 = vmatpush3.bf16.msra.mxu0 %v3145_v12  ;;  %2084 = vmatprep.mubr.msk.f32.mxu0 %vm2921_vm0, %v2922_v1  ;;  %v982_v51 = vand.u32 4294901760, %v952_v45 }
  0xcf   : > { %2442 = vmatprep.subr.bf16.mxu0 %v2920_v0 }
  0xd0   : > { %v3392_v40 = vsub.f32 %v952_v45, %v982_v51 }
  0xd2   : > { %2444 = vmatpush3.bf16.msra.mxu0 %v3148_v13  ;;  %v3701_v43 = vand.u32 4294901760, %v3392_v40 }
  0xd3   : > { %2445 = vmatprep.subr.bf16.mxu0 %v2920_v0 }
  0xd6   : > { %2447 = vmatpush3.bf16.msra.mxu0 %v3152_v18 }
  0xd7   : > { %2448 = vmatprep.subr.bf16.mxu0 %v2920_v0 }
  0xda   : > { %2450 = vmatpush3.bf16.msra.mxu0 %v3161_v26 }
  0xdb   : > { %2451 = vmatprep.subr.bf16.mxu0 %v2920_v0 }
  0xde   : > { %2453 = vmatpush3.bf16.msra.mxu0 %v3169_v38 }
  0xdf   : > { %2454 = vmatprep.subr.bf16.mxu0 %v2920_v0 }
  0xe2   : > { %2456 = vmatpush3.bf16.msra.mxu0 %v3193_v55 }
  0xe3   : > { %2457 = vmatprep.subr.bf16.mxu0 %v2920_v0 }
  0xe6   : > { %2459 = vmatpush3.bf16.msra.mxu0 %v3205_v62 }
  0xe7   : > { %2460 = vmatprep.subr.bf16.mxu0 %v2920_v0 }
  0xea   : > { %2462 = vmatpush3.bf16.msra.mxu0 %v3209_v2 }
  0xeb   : > { %2463 = vmatprep.subr.bf16.mxu0 %v2920_v0 }
  0xed   : > { %2085 = vmatmul.mubr.f32.vlgmr.msra.gmra.mrb[0].mxu0 %v376_v61  ;;  %v956_v61 = vld [vmem:[#allocation7 + $0x38] sm:$0xff] }
  0xee   : > { %2465 = vmatpush3.bf16.msra.mxu0 %v3234_v28  ;;  %2119 = vmatprep.mubr.msk.f32.mxu0 %vm2921_vm0, %v2922_v1  ;;  %v994_v63 = vand.u32 4294901760, %v956_v61  ;;  %v997_v28 = vand.u32 4294901760, %v957_v3 }
  0xef   : > { %2466 = vmatprep.subr.bf16.mxu0 %v2920_v0 }
  0xf0   : > { %v3400_v47 = vsub.f32 %v956_v61, %v994_v63  ;;  %v3402_v17 = vsub.f32 %v957_v3, %v997_v28 }
  0xf2   : > { %2468 = vmatpush3.bf16.msra.mxu0 %v3236_v29  ;;  %v1000_v29 = vand.u32 4294901760, %v958_v4 }
  0xf3   : > { %2469 = vmatprep.subr.bf16.mxu0 %v2920_v0 }
  0xf4   : > { %v3404_v49 = vsub.f32 %v958_v4, %v1000_v29 }
  0xf6   : > { %2471 = vmatpush3.bf16.msra.mxu0 %v3240_v32  ;;  %v3378_v32 = vpack.c.bf16 %v1000_v29, %v997_v28 }
  0xf7   : > { %2472 = vmatprep.subr.bf16.mxu0 %v2920_v0 }
  0xfa   : > { %2474 = vmatpush3.bf16.msra.mxu0 %v3242_v34  ;;  %v959_v34 = vld [vmem:[#allocation7 + $0x50] sm:$0xff] }
  0xfb   : > { %2475 = vmatprep.subr.bf16.mxu0 %v2920_v0 }
  0xfe   : > { %2477 = vmatpush3.bf16.msra.mxu0 %v3244_v35  ;;  %v960_v35 = vld [vmem:[#allocation7 + $0x58] sm:$0xff] }
  0xff   : > { %2478 = vmatprep.subr.bf16.mxu0 %v2920_v0 }
 0x102   : > { %2480 = vmatpush3.bf16.msra.mxu0 %v3247_v36  ;;  %v1003_v36 = vand.u32 4294901760, %v959_v34 }
 0x103   : > { %2481 = vmatprep.subr.bf16.mxu0 %v2920_v0 }
 0x104   : > { %v3406_v53 = vsub.f32 %v959_v34, %v1003_v36 }
 0x106   : > { %2483 = vmatpush3.bf16.msra.mxu0 %v3249_v37  ;;  %v1006_v37 = vand.u32 4294901760, %v960_v35  ;;  %v3694_v15 = vand.u32 4294901760, %v3406_v53 }
 0x107   : > { %2484 = vmatprep.subr.bf16.mxu0 %v2920_v0 }
 0x108   : > { %v3408_v56 = vsub.f32 %v960_v35, %v1006_v37  ;;  %v3696_v35 = vand.u32 4294901760, %v3402_v17  ;;  %v1137_v6 = vsub.f32 %v3406_v53, %v3694_v15 }
 0x10a   : > { %2486 = vmatpush3.bf16.msra.mxu0 %v3251_v39  ;;  %v3382_v39 = vpack.c.bf16 %v1006_v37, %v1003_v36  ;;  %v3695_v36 = vand.u32 4294901760, %v3404_v49  ;;  %v1123_v5 = vsub.f32 %v3402_v17, %v3696_v35  ;;  %v3693_v48 = vand.u32 4294901760, %v3408_v56 }
 0x10b   : > { %2487 = vmatprep.subr.bf16.mxu0 %v2920_v0 }
 0x10c   : > { %v1130_v7 = vsub.f32 %v3404_v49, %v3695_v36  ;;  %v1124_v8 = vand.u32 4294901760, %v1123_v5 }
 0x10d   : > { %2120 = vmatmul.mubr.f32.vlgmr.msra.gmra.mrb[0].mxu0 %v3164_v31 }
 0x10e   : > { %2489 = vmatpush3.bf16.msra.mxu0 %v3145_v12  ;;  %2154 = vmatprep.mubr.msk.f32.mxu0 %vm2921_vm0, %v2922_v1  ;;  %v949_v12 = vld [vmem:[#allocation7] sm:$0xff]  ;;  %v1131_v9 = vand.u32 4294901760, %v1130_v7 }
 0x10f   : > { %2490 = vmatprep.subr.bf16.mxu0 %v2920_v0 }
 0x110   : > { %v3476_v57 = vpack.c.bf16 %v1131_v9, %v1124_v8 }
 0x112   : > { %2492 = vmatpush3.bf16.msra.mxu0 %v3148_v13  ;;  %v950_v13 = vld [vmem:[#allocation7 + $0x8] sm:$0xff] }
 0x113   : > { %2493 = vmatprep.subr.bf16.mxu0 %v2920_v0 }
 0x116   : > { %2495 = vmatpush3.bf16.msra.mxu0 %v3152_v18  ;;  %v973_v18 = vand.u32 4294901760, %v949_v12 }
 0x117   : > { %2496 = vmatprep.subr.bf16.mxu0 %v2920_v0 }
 0x118   : > { %v3386_v10 = vsub.f32 %v949_v12, %v973_v18 }
 0x11a   : > { %2498 = vmatpush3.bf16.msra.mxu0 %v3161_v26  ;;  %v976_v26 = vand.u32 4294901760, %v950_v13  ;;  %v1066_v22 = vand.u32 4294901760, %v3386_v10 }
 0x11b   : > { %2499 = vmatprep.subr.bf16.mxu0 %v2920_v0 }
 0x11c   : > { %v3362_v44 = vpack.c.bf16 %v976_v26, %v973_v18  ;;  %v3388_v11 = vsub.f32 %v950_v13, %v976_v26  ;;  %v1067_v25 = vsub.f32 %v3386_v10, %v1066_v22  ;;  %v1088_v26 = vsub.f32 %v3392_v40, %v3701_v43 }
 0x11e   : > { %2501 = vmatpush3.bf16.msra.mxu0 %v3169_v38  ;;  %v951_v38 = vld [vmem:[#allocation7 + $0x10] sm:$0xff]  ;;  %2513 = vmatpush3.bf16.msra.mxu1 %v3362_v44  ;;  %v3703_v14 = vand.u32 4294901760, %v3388_v11  ;;  %v1068_v12 = vand.u32 4294901760, %v1067_v25  ;;  %v1144_v25 = vsub.f32 %v3408_v56, %v3693_v48  ;;  %v2560_v8 = vpack.c.bf16 %v3388_v11, %v3386_v10 }
 0x11f   : > { %2502 = vmatprep.subr.bf16.mxu0 %v2920_v0  ;;  %v979_v50 = vand.u32 4294901760, %v951_v38  ;;  %2514 = vmatprep.subr.bf16.mxu1 %v2920_v0 }
 0x120   : > { %v1074_v33 = vsub.f32 %v3388_v11, %v3703_v14 }
 0x121   : > { %v3366_v52 = vpack.c.bf16 %v982_v51, %v979_v50  ;;  %v3390_v30 = vsub.f32 %v951_v38, %v979_v50  ;;  %v1089_v50 = vand.u32 4294901760, %v1088_v26 }
 0x122   : > { %2504 = vmatpush3.bf16.msra.mxu0 %v3193_v55  ;;  %v954_v55 = vld [vmem:[#allocation7 + $0x28] sm:$0xff]  ;;  %v1075_v13 = vand.u32 4294901760, %v1074_v33  ;;  %v1138_v33 = vand.u32 4294901760, %v1137_v6 }
 0x123   : > { %2505 = vmatprep.subr.bf16.mxu0 %v2920_v0  ;;  %2516 = vmatpush3.bf16.msra.mxu1 %v3366_v52  ;;  %v988_v58 = vand.u32 4294901760, %v954_v55  ;;  %v3702_v42 = vand.u32 4294901760, %v3390_v30  ;;  %v2563_v9 = vpack.c.bf16 %v3392_v40, %v3390_v30 }
 0x124   : > { %2517 = vmatprep.subr.bf16.mxu1 %v2920_v0  ;;  %v3442_v38 = vpack.c.bf16 %v1075_v13, %v1068_v12  ;;  %v1145_v12 = vand.u32 4294901760, %v1144_v25  ;;  %v3692_v13 = vand.u32 4294901760, %v3412_v20 }
 0x125   : > { %v3396_v16 = vsub.f32 %v954_v55, %v988_v58  ;;  %v1081_v18 = vsub.f32 %v3390_v30, %v3702_v42 }
 0x126   : > { %2507 = vmatpush3.bf16.msra.mxu0 %v3205_v62  ;;  %v991_v62 = vand.u32 4294901760, %v955_v60  ;;  %v2551_v26 = vpack.c.bf16 %v1145_v12, %v1138_v33  ;;  %v2572_v33 = vpack.c.bf16 %v3404_v49, %v3402_v17  ;;  %v2575_v12 = vpack.c.bf16 %v3408_v56, %v3406_v53 }
 0x127   : > { %2508 = vmatprep.subr.bf16.mxu0 %v2920_v0  ;;  %v1082_v45 = vand.u32 4294901760, %v1081_v18  ;;  %v3691_v18 = vand.u32 4294901760, %v3414_v21 }
 0x128   : > { %v3398_v46 = vsub.f32 %v955_v60, %v991_v62 }
 0x129   : > { %v3446_v55 = vpack.c.bf16 %v1089_v50, %v1082_v45  ;;  %v1151_v45 = vsub.f32 %v3412_v20, %v3692_v13  ;;  %v1158_v50 = vsub.f32 %v3414_v21, %v3691_v18 }
 0x12a   : > { %2510 = vmatpush3.bf16.msra.mxu0 %v3209_v2  ;;  %v3374_v2 = vpack.c.bf16 %v994_v63, %v991_v62  ;;  %v3698_v62 = vand.u32 4294901760, %v3398_v46  ;;  %v3697_v63 = vand.u32 4294901760, %v3400_v47  ;;  %v2569_v25 = vpack.c.bf16 %v3400_v47, %v3398_v46 }
 0x12c   : > { %v1109_v4 = vsub.f32 %v3398_v46, %v3698_v62  ;;  %v1116_v28 = vsub.f32 %v3400_v47, %v3697_v63 }
 0x12d   : > { %2155 = vmatmul.mubr.f32.vlgmr.msra.gmra.mrb[0].mxu0 %v3164_v31  ;;  %v985_v31 = vand.u32 4294901760, %v953_v54 }
 0x12e   : > { %v1110_v29 = vand.u32 4294901760, %v1109_v4  ;;  %v1117_v34 = vand.u32 4294901760, %v1116_v28 }
 0x12f   : > { %v3370_v59 = vpack.c.bf16 %v988_v58, %v985_v31  ;;  %v3394_v41 = vsub.f32 %v953_v54, %v985_v31  ;;  %v3699_v54 = vand.u32 4294901760, %v3396_v16 }
 0x130   : > { %v3466_v37 = vpack.c.bf16 %v1117_v34, %v1110_v29 }
 0x131   : > { %2519 = vmatpush3.bf16.msra.mxu1 %v3370_v59  ;;  %v3700_v51 = vand.u32 4294901760, %v3394_v41  ;;  %v1102_v58 = vsub.f32 %v3396_v16, %v3699_v54  ;;  %v2566_v6 = vpack.c.bf16 %v3396_v16, %v3394_v41  ;;  %v3717_v10 = vand.u32 4294901760, %v3394_v41 }
 0x132   : > { %2520 = vmatprep.subr.bf16.mxu1 %v2920_v0 }
 0x133   : > { %v1095_v31 = vsub.f32 %v3394_v41, %v3700_v51  ;;  %v1103_v61 = vand.u32 4294901760, %v1102_v58  ;;  %v1159_v58 = vand.u32 4294901760, %v1158_v50  ;;  %v2581_v50 = vpack.c.bf16 %v3424_v24, %v3419_v23 }
 0x134   : > { %v3723_v41 = vand.u32 4294901760, %v3406_v53 }
 0x135   : > { %2522 = vmatpush3.bf16.msra.mxu1 %v3374_v2  ;;  %v1096_v60 = vand.u32 4294901760, %v1095_v31  ;;  %v1152_v31 = vand.u32 4294901760, %v1151_v45  ;;  %v2578_v45 = vpack.c.bf16 %v3414_v21, %v3412_v20 }
 0x136   : > { %2523 = vmatprep.subr.bf16.mxu1 %v2920_v0 }
 0x137   : > { %v3456_v3 = vpack.c.bf16 %v1103_v61, %v1096_v60  ;;  %v3690_v60 = vand.u32 4294901760, %v3419_v23  ;;  %v3689_v61 = vand.u32 4294901760, %v3424_v24  ;;  %v2554_v4 = vpack.c.bf16 %v1159_v58, %v1152_v31  ;;  %v1735_v31 = vld [vmem:[%s3682_s2] ss:$0 sm:$0xff] }
 0x139   : > { %2525 = vmatpush3.bf16.msra.mxu1 %v3378_v32  ;;  %v1165_v28 = vsub.f32 %v3419_v23, %v3690_v60  ;;  %v1172_v29 = vsub.f32 %v3424_v24, %v3689_v61 }
 0x13a   : > { %2526 = vmatprep.subr.bf16.mxu1 %v2920_v0 }
 0x13b   : > { %v1166_v34 = vand.u32 4294901760, %v1165_v28  ;;  %v1173_v5 = vand.u32 4294901760, %v1172_v29 }
 0x13d   : > { %2528 = vmatpush3.bf16.msra.mxu1 %v3382_v39  ;;  %v2557_v7 = vpack.c.bf16 %v1173_v5, %v1166_v34 }
 0x13e   : > { %2529 = vmatprep.subr.bf16.mxu1 %v2920_v0 }
 0x141   : > { %2531 = vmatpush3.bf16.msra.mxu1 %v3410_v19 }
 0x142   : > { %2532 = vmatprep.subr.bf16.mxu1 %v2920_v0 }
 0x145   : > { %2534 = vmatpush3.bf16.msra.mxu1 %v3422_v27 }
 0x146   : > { %2535 = vmatprep.subr.bf16.mxu1 %v2920_v0 }
 0x200   : > { %v930_v58 = vpop.f32.mrb[0].mxu0 }
 0x201   : > { %v2655_v28 = vadd.f32 %v1735_v31, %v930_v58  ;;  %v2156_v29 = vpop.f32.mrb[1].mxu0 }
 0x203   : > { %v1736_v34 = vclamps-f32 %v2655_v28, 7.999756 }
 0x205   : > { %v936_v5 = vmul.f32 4096.0, %v1736_v34 }
 0x207   : > { %v2677_v61 = vtrunc.f32 %v936_v5 }
 0x209   : > { %v2678_v60 = vcvt.f32.s32 %v2677_v61 }
 0x20b   : > { %v938_v18 = vcvt.s32.f32 %v2678_v60 }
 0x20d   : > { %v939_v13 = vmul.f32 0.00024414063, %v938_v18 }
 0x20f   : > { %v941_v48 = vmul.f32 0.70710677, %v939_v13  ;;  %v940_v36 = vmul.f32 0.5, %v939_v13 }
 0x211   : > { %2755 = verf.f32 %v941_v48 }
 0x21b   : > { %v2756_v15 = vpop.eup %2755 }
 0x21c   : > { %v943_v35 = vadd.f32 1.0, %v2756_v15 }
 0x21e   : > { %v944_v63 = vmul.f32 %v943_v35, %v940_v36 }
 0x220   : > { %v945_v62 = vmul.f32 4096.0, %v944_v63  ;;  %v3722_v63 = vand.u32 4294901760, %v3404_v49  ;;  %v3728_v49 = vand.u32 4294901760, %v3424_v24 }
 0x222   : > { %v2679_v54 = vtrunc.f32 %v945_v62  ;;  %v3721_v62 = vand.u32 4294901760, %v3402_v17  ;;  %v3727_v17 = vand.u32 4294901760, %v3419_v23 }
 0x224   : > { %v2680_v51 = vcvt.f32.s32 %v2679_v54 }
 0x226   : > { %v947_v43 = vcvt.s32.f32 %v2680_v51  ;;  %v3716_v51 = vand.u32 4294901760, %v3392_v40 }
 0x228   : > { %v948_v42 = vmul.f32 0.00024414063, %v947_v43 }
 0x22a   : > { %v3519_v14 = vand.u32 4294901760, %v948_v42 }
 0x22c   : > { %v1054_v31 = vsub.f32 %v948_v42, %v3519_v14  ;;  %v3714_v42 = vand.u32 4294901760, %v3388_v11  ;;  %v3718_v11 = vand.u32 4294901760, %v3396_v16  ;;  %v3724_v16 = vand.u32 4294901760, %v3408_v56 }
 0x22e   : > { %v1055_v58 = vand.u32 4294901760, %v1054_v31  ;;  %v2608_v43 = vpack.c.bf16 %v3714_v42, %v1066_v22  ;;  %v2614_v22 = vpack.c.bf16 %v3718_v11, %v3717_v10  ;;  %v2623_v35 = vpack.c.bf16 %v3724_v16, %v3723_v41 }
 0x230   : > { %v1056_v28 = vsub.f32 %v1054_v31, %v1055_v58 }
 0x232   : > { %v1057_v61 = vand.u32 4294901760, %v1056_v28 }
 0x234   : > { %2190 = vmatmul.mubr.f32.vlgmr.msra.gmra.mrb[0].mxu1 %v1057_v61 }
 0x235   : > { %2537 = vmatpush3.bf16.msra.mxu1 %v3442_v38  ;;  %2224 = vmatprep.mubr.msk.f32.mxu1 %vm2921_vm0, %v2922_v1  ;;  %v3715_v38 = vand.u32 4294901760, %v3390_v30  ;;  %v3720_v30 = vand.u32 4294901760, %v3400_v47  ;;  %v3726_v47 = vand.u32 4294901760, %v3414_v21 }
 0x236   : > { %2538 = vmatprep.subr.bf16.mxu1 %v2920_v0 }
 0x237   : > { %v2611_v54 = vpack.c.bf16 %v3716_v51, %v3715_v38 }
 0x239   : > { %2540 = vmatpush3.bf16.msra.mxu1 %v3446_v55  ;;  %v3719_v55 = vand.u32 4294901760, %v3398_v46  ;;  %v3725_v46 = vand.u32 4294901760, %v3412_v20 }
 0x23a   : > { %2541 = vmatprep.subr.bf16.mxu1 %v2920_v0 }
 0x23b   : > { %v2617_v40 = vpack.c.bf16 %v3720_v30, %v3719_v55  ;;  %v2626_v36 = vpack.c.bf16 %v3726_v47, %v3725_v46 }
 0x23d   : > { %2543 = vmatpush3.bf16.msra.mxu1 %v3456_v3  ;;  %v2620_v3 = vpack.c.bf16 %v3722_v63, %v3721_v62 }
 0x23e   : > { %2544 = vmatprep.subr.bf16.mxu1 %v2920_v0 }
 0x241   : > { %2546 = vmatpush3.bf16.msra.mxu1 %v3466_v37  ;;  %v2629_v37 = vpack.c.bf16 %v3728_v49, %v3727_v17 }
 0x242   : > { %2547 = vmatprep.subr.bf16.mxu1 %v2920_v0 }
 0x245   : > { %2549 = vmatpush3.bf16.msra.mxu1 %v3476_v57 }
 0x246   : > { %2550 = vmatprep.subr.bf16.mxu1 %v2920_v0 }
 0x249   : > { %2552 = vmatpush3.bf16.msra.mxu1 %v2551_v26 }
 0x24a   : > { %2553 = vmatprep.subr.bf16.mxu1 %v2920_v0 }
 0x24d   : > { %2555 = vmatpush3.bf16.msra.mxu1 %v2554_v4 }
 0x24e   : > { %2556 = vmatprep.subr.bf16.mxu1 %v2920_v0 }
 0x251   : > { %2558 = vmatpush3.bf16.msra.mxu1 %v2557_v7 }
 0x252   : > { %2559 = vmatprep.subr.bf16.mxu1 %v2920_v0 }
 0x254   : > { %2225 = vmatmul.mubr.f32.vlgmr.msra.gmra.mrb[0].mxu1 %v3519_v14 }
 0x255   : > { %2561 = vmatpush3.bf16.msra.mxu1 %v2560_v8  ;;  %2259 = vmatprep.mubr.msk.f32.mxu1 %vm2921_vm0, %v2922_v1 }
 0x256   : > { %2562 = vmatprep.subr.bf16.mxu1 %v2920_v0 }
 0x259   : > { %2564 = vmatpush3.bf16.msra.mxu1 %v2563_v9 }
 0x25a   : > { %2565 = vmatprep.subr.bf16.mxu1 %v2920_v0 }
 0x25d   : > { %2567 = vmatpush3.bf16.msra.mxu1 %v2566_v6 }
 0x25e   : > { %2568 = vmatprep.subr.bf16.mxu1 %v2920_v0 }
 0x261   : > { %2570 = vmatpush3.bf16.msra.mxu1 %v2569_v25 }
 0x262   : > { %2571 = vmatprep.subr.bf16.mxu1 %v2920_v0 }
 0x265   : > { %2573 = vmatpush3.bf16.msra.mxu1 %v2572_v33 }
 0x266   : > { %2574 = vmatprep.subr.bf16.mxu1 %v2920_v0 }
 0x269   : > { %2576 = vmatpush3.bf16.msra.mxu1 %v2575_v12 }
 0x26a   : > { %2577 = vmatprep.subr.bf16.mxu1 %v2920_v0 }
 0x26d   : > { %2579 = vmatpush3.bf16.msra.mxu1 %v2578_v45 }
 0x26e   : > { %2580 = vmatprep.subr.bf16.mxu1 %v2920_v0 }
 0x271   : > { %2582 = vmatpush3.bf16.msra.mxu1 %v2581_v50 }
 0x272   : > { %2583 = vmatprep.subr.bf16.mxu1 %v2920_v0 }
 0x274   : > { %2260 = vmatmul.mubr.f32.vlgmr.msra.gmra.mrb[0].mxu1 %v1054_v31 }
 0x275   : > { %2585 = vmatpush3.bf16.msra.mxu1 %v3362_v44  ;;  %2294 = vmatprep.mubr.msk.f32.mxu1 %vm2921_vm0, %v2922_v1 }
 0x276   : > { %2586 = vmatprep.subr.bf16.mxu1 %v2920_v0 }
 0x279   : > { %2588 = vmatpush3.bf16.msra.mxu1 %v3366_v52 }
 0x27a   : > { %2589 = vmatprep.subr.bf16.mxu1 %v2920_v0 }
 0x27d   : > { %2591 = vmatpush3.bf16.msra.mxu1 %v3370_v59 }
 0x27e   : > { %2592 = vmatprep.subr.bf16.mxu1 %v2920_v0 }
 0x281   : > { %2594 = vmatpush3.bf16.msra.mxu1 %v3374_v2 }
 0x282   : > { %2595 = vmatprep.subr.bf16.mxu1 %v2920_v0 }
 0x285   : > { %2597 = vmatpush3.bf16.msra.mxu1 %v3378_v32 }
 0x286   : > { %2598 = vmatprep.subr.bf16.mxu1 %v2920_v0 }
 0x289   : > { %2600 = vmatpush3.bf16.msra.mxu1 %v3382_v39 }
 0x28a   : > { %2601 = vmatprep.subr.bf16.mxu1 %v2920_v0 }
 0x28d   : > { %2603 = vmatpush3.bf16.msra.mxu1 %v3410_v19 }
 0x28e   : > { %2604 = vmatprep.subr.bf16.mxu1 %v2920_v0 }
 0x291   : > { %2606 = vmatpush3.bf16.msra.mxu1 %v3422_v27 }
 0x292   : > { %2607 = vmatprep.subr.bf16.mxu1 %v2920_v0 }
 0x294   : > { %2295 = vmatmul.mubr.f32.vlgmr.msra.gmra.mrb[0].mxu1 %v1055_v58 }
 0x295   : > { %2609 = vmatpush3.bf16.msra.mxu1 %v2608_v43  ;;  %2329 = vmatprep.mubr.msk.f32.mxu1 %vm2921_vm0, %v2922_v1 }
 0x296   : > { %2610 = vmatprep.subr.bf16.mxu1 %v2920_v0 }
 0x299   : > { %2612 = vmatpush3.bf16.msra.mxu1 %v2611_v54 }
 0x29a   : > { %2613 = vmatprep.subr.bf16.mxu1 %v2920_v0 }
 0x29d   : > { %2615 = vmatpush3.bf16.msra.mxu1 %v2614_v22 }
 0x29e   : > { %2616 = vmatprep.subr.bf16.mxu1 %v2920_v0 }
 0x2a1   : > { %2618 = vmatpush3.bf16.msra.mxu1 %v2617_v40 }
 0x2a2   : > { %2619 = vmatprep.subr.bf16.mxu1 %v2920_v0 }
 0x2a5   : > { %2621 = vmatpush3.bf16.msra.mxu1 %v2620_v3 }
 0x2a6   : > { %2622 = vmatprep.subr.bf16.mxu1 %v2920_v0 }
 0x2a9   : > { %2624 = vmatpush3.bf16.msra.mxu1 %v2623_v35 }
 0x2aa   : > { %2625 = vmatprep.subr.bf16.mxu1 %v2920_v0 }
 0x2ad   : > { %2627 = vmatpush3.bf16.msra.mxu1 %v2626_v36 }
 0x2ae   : > { %2628 = vmatprep.subr.bf16.mxu1 %v2920_v0 }
 0x2b1   : > { %2630 = vmatpush3.bf16.msra.mxu1 %v2629_v37 }
 0x2b2   : > { %2631 = vmatprep.subr.bf16.mxu1 %v2920_v0 }
 0x2b4   : > { %2330 = vmatmul.mubr.f32.vlgmr.msra.gmra.mrb[0].mxu1 %v3519_v14 }
 0x2b5   : > { %2633 = vmatpush3.bf16.msra.mxu1 %v3362_v44  ;;  %2364 = vmatprep.mubr.msk.f32.mxu1 %vm2921_vm0, %v2922_v1  ;;  %v1737_v1 = vld [vmem:[%s3684_s4] ss:$0 sm:$0xff] }
 0x2b6   : > { %2634 = vmatprep.subr.bf16.mxu1 %v2920_v0 }
 0x2b9   : > { %2636 = vmatpush3.bf16.msra.mxu1 %v3366_v52 }
 0x2ba   : > { %2637 = vmatprep.subr.bf16.mxu1 %v2920_v0 }
 0x2bd   : > { %2639 = vmatpush3.bf16.msra.mxu1 %v3370_v59 }
 0x2be   : > { %2640 = vmatprep.subr.bf16.mxu1 %v2920_v0 }
 0x2c1   : > { %2642 = vmatpush3.bf16.msra.mxu1 %v3374_v2 }
 0x2c2   : > { %2643 = vmatprep.subr.bf16.mxu1 %v2920_v0 }
 0x2c5   : > { %2645 = vmatpush3.bf16.msra.mxu1 %v3378_v32 }
 0x2c6   : > { %2646 = vmatprep.subr.bf16.mxu1 %v2920_v0 }
 0x2c9   : > { %2648 = vmatpush3.bf16.msra.mxu1 %v3382_v39 }
 0x2ca   : > { %2649 = vmatprep.subr.bf16.mxu1 %v2920_v0 }
 0x2cd   : > { %2651 = vmatpush3.bf16.msra.mxu1 %v3410_v19 }
 0x2ce   : > { %2652 = vmatprep.subr.bf16.mxu1 %v2920_v0 }
 0x2d1   : > { %2654 = vmatpush3.bf16.msra.mxu1 %v3422_v27 }
 0x2d4   : > { %2365 = vmatmul.mubr.f32.vlgmr.msra.gmra.mrb[0].mxu1 %v3519_v14 }
 0x3a7   : > { %v1609_v44 = vpop.f32.mrb[0].mxu1 }
 0x3a8   : > { %v2656_v52 = vadd.f32 %v1737_v1, %v1609_v44  ;;  %v2366_v59 = vpop.f32.mrb[1].mxu1 }
 0x3aa   : > { %v1738_v2 = vclamps-f32 %v2656_v52, 7.999756 }
 0x3ac   : > { %v1615_v32 = vmul.f32 4096.0, %v1738_v2 }
 0x3ae   : > { %v2681_v39 = vtrunc.f32 %v1615_v32 }
 0x3b0   : > { %v2682_v53 = vcvt.f32.s32 %v2681_v39 }
 0x3b2   : > { %v1617_v0 = vcvt.s32.f32 %v2682_v53 }
 0x3b4   : > { %v1618_v56 = vmul.f32 0.00024414063, %v1617_v0 }
 0x3b6   : > { %1619 = vst [vmem:[%s268_s28] sm:$0xff] %v1618_v56 }
 0x3b7   : > { %2856 = shalt.err (!%p2853_p2)
}
 0x3b8   : > { %s2857_s12 = scalar_lea.hbm %s3636_s15, 128  ;;  %s2861_s26 = scalar_lea.hbm %s3685_s5, 256 }
 0x3b9   : > { %p2858_p13 = scmp.ne.s32.totalorder %s3636_s15, %s2857_s12  ;;  %p2862_p4 = scmp.lt.u32.totalorder %s3636_s15, %s3685_s5 }
 0x3ba   : > { %p2863_p5 = scmp.lt.u32.totalorder %s2861_s26, %s2857_s12  ;;  %p2865_p11 = scmp.lt.u32.totalorder %s2857_s12, %s3636_s15 }
 0x3bb   : > { %p2859_p6 = pnand %p2858_p13, %p3729_p0 }
 0x3bc   : > { %p2864_p8 = por %p2863_p5, %p2862_p4 }
 0x3bd   : > { %p2860_p10 = pneg %p2859_p6 }
 0x3be   : > { %p2866_p1 = por %p2865_p11, %p2864_p8 }
 0x3c0   : > { %p2867_p3 = pnand %p2866_p1, %p2860_p10 }
 0x3c2   : > { %2870 = shalt.err (!%p2867_p3)
}
 0x3c3   : > { %2693 = dma.vmem_to_hbm [thread:$0]  (%p3729_p0), %s3638_s7, 128, %s3636_s15, %s1621_s16  }
 0x3c4 PF: > { %s1646_s11 = sand.u32 1, %s2901_s18   ;;  %p3730_p7 = scmp.ne.s32.totalorder %s3705_s25, 0 }
 0x3c5   : > { %p3731_p9 = scmp.ge.s32.totalorder %s2913_s21, 2  ;;  %s1647_s28 = scalar_lea.sflag [#allocation4], %s1646_s11 }
 0x3c7   : > { %p2707_p12 = pnand %p3731_p9, %p3730_p7 }
 0x3c9   : > { %2896 = dma.done.wait (!%p2707_p12), %s1647_s28, 128  }
 0x3ca   : > { %2898 = vsyncadd (!%p2707_p12), %s1647_s28, 4294967168  ;;  %p19_p2 = scmp.ge.s32.totalorder %s3064_s14, 4   ;;  %s3732_s18 = smov %s2905_s19 }
 0x3cb   : > { %s3733_s19 = smov %s2909_s20  ;;  %s3734_s20 = smov %s3080_s27 }
 0x3cc   : > { %s3735_s21 = smov %s3064_s14  ;;  %21 = sbr.rel (!%p19_p2) target bundleno = 6 (0x6), region = 93 }
 0x3d3   :  { %1652 = vsyncpa [#allocation3], 1 }
 0x3d4   :  { %1654 = vsyncpa [#allocation3 + $0x1], 1 }
 0x3d5   :  { %1655 = vsyncpa [#allocation6], 1 }
 0x3d6   :  { %1656 = vsyncpa [#allocation4], 1 }
 0x3d7   :  { %1658 = vsyncpa [#allocation4 + $0x1], 1 }

// kernel: tpu_custom_call.1
= control target key start
LH: loop header
LB: loop body
LE: loop exit
PB: predicated region body
PF: predicated region fallthrough
CT: control target
= control target key end

     0   :  { %10 = vsyncpa [#allocation3], 0  ;;  %s3680_s0 = inlined_call_operand.hbm [shape: f32[16,128], index: 0, kind: input, shape index: {}]   ;;  %s3681_s1 = inlined_call_operand.hbm [shape: f32[128,128], index: 1, kind: input, shape index: {}]   ;;  %s3682_s2 = inlined_call_operand.vmem [shape: f32[1,128], index: 2, kind: input, shape index: {}]   ;;  %s3683_s3 = inlined_call_operand.hbm [shape: f32[128,128], index: 3, kind: input, shape index: {}]   ;;  %s3684_s4 = inlined_call_operand.vmem [shape: f32[1,128], index: 4, kind: input, shape index: {}]   ;;  %s3685_s5 = inlined_call_operand.hbm [shape: f32[16,128], index: 5, kind: output, shape index: {}]  }
   0x1   :  { %12 = vsyncpa [#allocation3 + $0x1], 0 }
   0x2   :  { %13 = vsyncpa [#allocation6], 0 }
   0x3   :  { %14 = vsyncpa [#allocation4], 0 }
   0x4   :  { %16 = vsyncpa [#allocation4 + $0x1], 0  ;;  %s2954_s18 = smov 0   ;;  %s2956_s19 = smov 0  }
   0x5   :  { %s2958_s20 = smov 0   ;;  %s2960_s21 = smov 0  }
   0x6 LB: > { %s2975_s22 = sadd.s32 4294967295, %s2913_s21   ;;  %s1723_s23 = sadd.s32 4294967294, %s2913_s21   ;;  %s2913_s21 = sphi %s2960_s21, %s3735_s21   ;;  %s2909_s20 = sphi %s2958_s20, %s3734_s20   ;;  %s2905_s19 = sphi %s2956_s19, %s3733_s19   ;;  %s2901_s18 = sphi %s2954_s18, %s3732_s18  }
   0x7   : > { %p42_p0 = scmp.ne.s32.totalorder %s2905_s19, %s2901_s18  ;;  %p3686_p1 = scmp.eq.s32.totalorder %s2975_s22, 0 }
   0x8   : > { %p156_p3 = scmp.eq.s32.totalorder %s1723_s23, 1  ;;  %p1724_p5 = scmp.ge.s32.totalorder %s2913_s21, 1 }
   0x9   : > { %p2984_p4 = por %p3686_p1, %p42_p0  ;;  %p163_p7 = scmp.lt.s32.totalorder %s2913_s21, 3 }
   0xa   : > { %p2989_p6 = por %p156_p3, %p42_p0  ;;  %s2915_s27 = smov [#allocation5]  }
   0xb   : > { %s3704_s24 = scalar_select %p2984_p4, 1, 0 }
   0xc   : > { %s3705_s25 = scalar_select %p2989_p6, 1, 0 }
   0xd   : > { %p2994_p8 = pnand %p1724_p5, %p163_p7  ;;  %s175_s28 = sshll.u32 %s2915_s27, 4  ;;  %s2998_s28 = int_to_ptr.vmem [resolvable:$true] %s175_s28 }
   0xe   : > { %s2916_s30 = smov [#allocation7]   ;;  %s2757_s9 = scalar_lea.hbm %s3681_s1, 2048 }
   0xf   : > { %p2695_p9 = pneg %p2994_p8  ;;  %s191_s6 = sshll.u32 %s2916_s30, 4  ;;  %s3009_s6 = int_to_ptr.vmem [resolvable:$true] %s191_s6 }
  0x10   : > { %p2758_p12 = scmp.ne.s32.totalorder %s3681_s1, %s2757_s9  ;;  %p2764_p5 = scmp.lt.u32.totalorder %s2757_s9, %s3681_s1 }
  0x11   : > { %p3005_p11 = pnand %p2695_p9, %p3686_p1 }
  0x13   : > { %p2759_p13 = pneg %p3005_p11 }
  0x15   : > { %p2760_p0 = pnand %p2759_p13, %p2758_p12 }
  0x17   : > { %p2761_p3 = pneg %p2760_p0 }
  0x19   : > { %p2766_p7 = pnand %p2764_p5, %p2761_p3 }
  0x1b   : > { %2769 = shalt.err (!%p2766_p7)
}
  0x1c   : > { %s2770_s14 = scalar_lea.vmem %s2998_s28, 2048  ;;  %p2778_p2 = scmp.lt.s32.totalorder %s2998_s28, %s2998_s28 }
  0x1d   : > { %p2771_p9 = scmp.ne.s32.totalorder %s2998_s28, %s2770_s14  ;;  %p2779_p12 = scmp.lt.s32.totalorder %s2770_s14, %s2770_s14 }
  0x1f   : > { %p2773_p10 = pnand %p2771_p9, %p2759_p13  ;;  %p2780_p0 = por %p2779_p12, %p2778_p2 }
  0x21   : > { %p2774_p1 = pneg %p2773_p10 }
  0x23   : > { %p2781_p6 = pnand %p2780_p0, %p2774_p1 }
  0x25   : > { %2784 = shalt.err (!%p2781_p6)
}
  0x26   : > { %s2917_s15 = smov 128   ;;  %s2918_s16 = smov 8  }
  0x27   : > { %2698 = dma.hbm_to_vmem [thread:$0]  (!%p3005_p11), %s3681_s1, 2048, %s2998_s28, [#allocation6], %s2917_s15, %s2917_s15, %s2918_s16  }
  0x28   : > { %s2785_s7 = scalar_lea.hbm %s3683_s3, 2048 }
  0x29   : > { %p2786_p2 = scmp.ne.s32.totalorder %s3683_s3, %s2785_s7  ;;  %p2792_p10 = scmp.lt.u32.totalorder %s2785_s7, %s3683_s3 }
  0x2b   : > { %p2788_p1 = pnand %p2786_p2, %p2759_p13 }
  0x2d   : > { %p2789_p6 = pneg %p2788_p1 }
  0x2f   : > { %p2794_p3 = pnand %p2792_p10, %p2789_p6 }
  0x31   : > { %2797 = shalt.err (!%p2794_p3)
}
  0x32   : > { %s2798_s28 = scalar_lea.vmem %s3009_s6, 2048  ;;  %p2806_p12 = scmp.lt.s32.totalorder %s3009_s6, %s3009_s6 }
  0x33   : > { %p2799_p5 = scmp.ne.s32.totalorder %s3009_s6, %s2798_s28  ;;  %p2807_p0 = scmp.lt.s32.totalorder %s2798_s28, %s2798_s28 }
  0x35   : > { %p2801_p7 = pnand %p2799_p5, %p2759_p13  ;;  %p2808_p2 = por %p2807_p0, %p2806_p12 }
  0x37   : > { %p2802_p9 = pneg %p2801_p7 }
  0x39   : > { %p2809_p1 = pnand %p2808_p2, %p2802_p9 }
  0x3b   : > { %2812 = shalt.err (!%p2809_p1)
}
  0x3c   : > { %2701 = dma.hbm_to_vmem [thread:$0]  (!%p3005_p11), %s3683_s3, 2048, %s3009_s6, [#allocation6], %s2917_s15, %s2917_s15, %s2918_s16  }
  0x3d   : > { %s3064_s14 = sadd.s32 1, %s2913_s21   ;;  %s29_s29 = sadd.s32 1, %s2909_s20 }
  0x3e   : > { %s26_s17 = ssub.s32 %s2913_s21, %s3064_s14  ;;  %p36_p13 = scmp.ne.s32.totalorder %s2909_s20, %s2905_s19 }
  0x3f   : > { %p27_p6 = scmp.eq.s32.totalorder %s26_s17, 0  ;;  %p37_p10 = scmp.eq.s32.totalorder %s2913_s21, 0 }
  0x40   : > { %p3708_p3 = scmp.eq.s32.totalorder %s2975_s22, 1  ;;  %p2712_p7 = scmp.lt.s32.totalorder %s2913_s21, 2 }
  0x41   : > { %s3080_s27 = scalar_select %p27_p6, %s2909_s20, %s29_s29  }
  0x42   : > { %p3074_p5 = por %p3708_p3, %p36_p13  ;;  %p38_p9 = por %p37_p10, %p36_p13 }
  0x43   : > { %s208_s30 = sand.u32 1, %s2909_s20   ;;  %s1729_s6 = sshll.u32 %s2913_s21, 7 }
  0x44   : > { %s3709_s23 = scalar_select %p3074_p5, 1, 0 }
  0x45   : > { %s1728_s7 = sshll.u32 %s208_s30, 3  ;;  %s3087_s8 = scalar_lea.hbm %s3680_s0, %s1729_s6 }
  0x46   : > { %s212_s9 = scalar_lea.vmem [#allocation2], %s1728_s7  ;;  %p3091_p11 = pnand %p2712_p7, %p38_p9 }
  0x47   : > { %s219_s10 = sshll.u32 %s212_s9, 4  ;;  %s209_s28 = scalar_lea.sflag [#allocation3], %s208_s30  ;;  %s3089_s10 = int_to_ptr.vmem [resolvable:$true] %s219_s10 }
  0x48   : > { %s2813_s12 = scalar_lea.hbm %s3087_s8, 128  ;;  %p2815_p0 = pneg %p3091_p11 }
  0x49   : > { %p2814_p12 = scmp.ne.s32.totalorder %s3087_s8, %s2813_s12  ;;  %s2818_s17 = scalar_lea.hbm %s3680_s0, 256 }
  0x4a   : > { %p2819_p13 = scmp.lt.u32.totalorder %s3087_s8, %s3680_s0  ;;  %p2820_p6 = scmp.lt.u32.totalorder %s2818_s17, %s2813_s12 }
  0x4b   : > { %p2816_p2 = pnand %p2815_p0, %p2814_p12  ;;  %p2822_p3 = scmp.lt.u32.totalorder %s2813_s12, %s3087_s8 }
  0x4c   : > { %p2821_p10 = por %p2820_p6, %p2819_p13 }
  0x4d   : > { %p2817_p1 = pneg %p2816_p2 }
  0x4e   : > { %p2823_p7 = por %p2822_p3, %p2821_p10 }
  0x50   : > { %p2824_p9 = pnand %p2823_p7, %p2817_p1 }
  0x52   : > { %2827 = shalt.err (!%p2824_p9)
}
  0x53   : > { %s2828_s30 = scalar_lea.vmem %s3089_s10, 128  ;;  %s2919_s15 = smov [#allocation2]  }
  0x54   : > { %p2829_p12 = scmp.ne.s32.totalorder %s3089_s10, %s2828_s30  ;;  %s2833_s16 = sshll.u32 %s2919_s15, 4  ;;  %s2834_s16 = int_to_ptr.vmem [resolvable:$false] %s2833_s16 }
  0x55   : > { %s2835_s9 = scalar_lea.vmem %s2834_s16, 256  ;;  %p2836_p4 = scmp.lt.s32.totalorder %s3089_s10, %s2834_s16 }
  0x56   : > { %p2831_p2 = pnand %p2829_p12, %p2815_p0  ;;  %p2837_p13 = scmp.lt.s32.totalorder %s2835_s9, %s2828_s30 }
  0x58   : > { %p2832_p5 = pneg %p2831_p2  ;;  %p2838_p6 = por %p2837_p13, %p2836_p4 }
  0x5a   : > { %p2839_p10 = pnand %p2838_p6, %p2832_p5 }
  0x5c   : > { %2842 = shalt.err (!%p2839_p10)
}
  0x5d   : > { %2705 = dma.hbm_to_vmem [thread:$0]  (!%p3091_p11), %s3087_s8, 128, %s3089_s10, %s209_s28  }
  0x5e   : > { %228 = sbr.rel (%p2994_p8) target bundleno = 964 (0x3c4), region = 40  ;;  %s3123_s12 = sand.u32 (!%p2994_p8), 1, %s2905_s19  }
  0x5f   : > { %s1731_s13 = sshll.u32 (!%p2994_p8), %s3123_s12, 3  ;;  %s231_s29 = scalar_lea.sflag (!%p2994_p8), [#allocation3], %s3123_s12 }
  0x60   : > { %s3129_s17 = scalar_lea.vmem (!%p2994_p8), [#allocation2], %s1731_s13  ;;  %p3711_p4 = scmp.ne.s32.totalorder (!%p2994_p8), %s3704_s24, 0 }
  0x65   : > { %2888 = dma.done.wait (%p3711_p4), %s231_s29, 128  }
  0x66   : > { %2890 = vsyncadd (%p3711_p4), %s231_s29, 4294967168  ;;  %p3712_p5 = scmp.eq.s32.totalorder %s2975_s22, 0 }
  0x68   : > { %2892 = dma.done.wait (%p3712_p5), [#allocation6], 4096   ;;  %p3713_p8 = pmov %p3712_p5 }
  0x69   : > { %v2920_v0 = vmov 0.0|0.0   ;;  %vm2921_vm0 = vmmov 0   ;;  %v2922_v1 = vmov 0.0   ;;  %v270_v2 = vld [vmem:[#allocation5] sm:$0xff]  ;;  %v271_v3 = vld [vmem:[#allocation5 + $0x8] sm:$0xff]  ;;  %v272_v4 = vld [vmem:[#allocation5 + $0x10] sm:$0xff] }
  0x6a   : > { %2894 = vsyncadd (%p3713_p8), [#allocation6], 4294963200  ;;  %2367 = vmatprep.subr.bf16.mxu0 %v2920_v0  ;;  %1979 = vmatprep.mubr.msk.f32.mxu0 %vm2921_vm0, %v2922_v1  ;;  %v294_v5 = vand.u32 4294901760, %v270_v2  ;;  %v297_v6 = vand.u32 4294901760, %v271_v3  ;;  %v273_v7 = vld [vmem:[#allocation5 + $0x18] sm:$0xff]  ;;  %v300_v8 = vand.u32 4294901760, %v272_v4 }
  0x6b   : > { %2511 = vmatprep.subr.bf16.mxu1 %v2920_v0  ;;  %2189 = vmatprep.mubr.msk.f32.mxu1 %vm2921_vm0, %v2922_v1  ;;  %v303_v9 = vand.u32 4294901760, %v273_v7  ;;  %v274_v10 = vld [vmem:[#allocation5 + $0x20] sm:$0xff]  ;;  %v275_v11 = vld [vmem:[#allocation5 + $0x28] sm:$0xff]  ;;  %v276_v16 = vld [vmem:[#allocation5 + $0x30] sm:$0xff]  ;;  %s1740_s11 = sshll.u32 %s2975_s22, 7  ;;  %s268_s28 = scalar_lea.vmem [#allocation8], %s1731_s13 }
  0x6c   : > { %v3145_v12 = vpack.c.bf16 %v297_v6, %v294_v5  ;;  %v306_v14 = vand.u32 4294901760, %v274_v10  ;;  %v309_v15 = vand.u32 4294901760, %v275_v11  ;;  %v277_v17 = vld [vmem:[#allocation5 + $0x38] sm:$0xff]  ;;  %v312_v19 = vand.u32 4294901760, %v276_v16  ;;  %v278_v21 = vld [vmem:[#allocation5 + $0x40] sm:$0xff]  ;;  %v279_v22 = vld [vmem:[#allocation5 + $0x48] sm:$0xff]  ;;  %s3636_s15 = scalar_lea.hbm %s3685_s5, %s1740_s11 }
  0x6d   : > { %v3148_v13 = vpack.c.bf16 %v303_v9, %v300_v8  ;;  %v315_v20 = vand.u32 4294901760, %v277_v17  ;;  %v269_v23 = vld [vmem:[%s3129_s17] sm:$0xff]  ;;  %v3156_v24 = vsub.f32 %v270_v2, %v294_v5  ;;  %v3158_v25 = vsub.f32 %v271_v3, %v297_v6  ;;  %v282_v32 = vld [vmem:[#allocation5 + $0x60] sm:$0xff]  ;;  %v283_v35 = vld [vmem:[#allocation5 + $0x68] sm:$0xff]  ;;  %s1634_s7 = sshll.u32 %s268_s28, 4  ;;  %s1621_s16 = scalar_lea.sflag [#allocation4], %s3123_s12  ;;  %s3638_s7 = int_to_ptr.vmem [resolvable:$true] %s1634_s7 }
  0x6e   : > { %2369 = vmatpush3.bf16.msra.mxu0 %v3145_v12  ;;  %v3152_v18 = vpack.c.bf16 %v309_v15, %v306_v14  ;;  %v318_v27 = vand.u32 4294901760, %v278_v21  ;;  %v321_v28 = vand.u32 4294901760, %v279_v22  ;;  %v280_v29 = vld [vmem:[#allocation5 + $0x50] sm:$0xff]  ;;  %v281_v30 = vld [vmem:[#allocation5 + $0x58] sm:$0xff]  ;;  %v3164_v31 = vand.u32 4294901760, %v269_v23  ;;  %s2843_s9 = scalar_lea.vmem %s3638_s7, 128 }
  0x6f   : > { %2370 = vmatprep.subr.bf16.mxu0 %v2920_v0  ;;  %v3161_v26 = vpack.c.bf16 %v315_v20, %v312_v19  ;;  %v3166_v33 = vsub.f32 %v272_v4, %v300_v8  ;;  %v324_v34 = vand.u32 4294901760, %v280_v29  ;;  %v284_v36 = vld [vmem:[#allocation5 + $0x70] sm:$0xff]  ;;  %v285_v37 = vld [vmem:[#allocation5 + $0x78] sm:$0xff]  ;;  %v327_v39 = vand.u32 4294901760, %v281_v30  ;;  %p2844_p11 = scmp.ne.s32.totalorder %s3638_s7, %s2843_s9  ;;  %p3729_p0 = scmp.ne.s32.totalorder %s3709_s23, 0 }
  0x70   : > { %v3169_v38 = vpack.c.bf16 %v321_v28, %v318_v27  ;;  %v387_v40 = vand.u32 4294901760, %v3156_v24  ;;  %v394_v41 = vand.u32 4294901760, %v3158_v25  ;;  %v3173_v42 = vsub.f32 %v273_v7, %v303_v9  ;;  %s2923_s22 = smov [#allocation8]  }
  0x71   : > { %v3175_v43 = vsub.f32 %v274_v10, %v306_v14  ;;  %v3177_v44 = vsub.f32 %v275_v11, %v309_v15  ;;  %v3181_v45 = vsub.f32 %v269_v23, %v3164_v31  ;;  %v330_v46 = vand.u32 4294901760, %v282_v32  ;;  %p2845_p1 = pnand %p2844_p11, %p3729_p0  ;;  %s2847_s13 = sshll.u32 %s2923_s22, 4  ;;  %s2848_s13 = int_to_ptr.vmem [resolvable:$false] %s2847_s13 }
  0x72   : > { %2372 = vmatpush3.bf16.msra.mxu0 %v3148_v13  ;;  %v333_v47 = vand.u32 4294901760, %v283_v35  ;;  %v336_v48 = vand.u32 4294901760, %v284_v36  ;;  %v339_v49 = vand.u32 4294901760, %v285_v37  ;;  %v3183_v50 = vsub.f32 %v276_v16, %v312_v19  ;;  %s2849_s29 = scalar_lea.vmem %s2848_s13, 256  ;;  %p2850_p7 = scmp.lt.s32.totalorder %s3638_s7, %s2848_s13 }
  0x73   : > { %2373 = vmatprep.subr.bf16.mxu0 %v2920_v0  ;;  %v3185_v51 = vsub.f32 %v277_v17, %v315_v20  ;;  %v3187_v52 = vsub.f32 %v278_v21, %v318_v27  ;;  %v401_v53 = vand.u32 4294901760, %v3166_v33  ;;  %v3191_v54 = vsub.f32 %v279_v22, %v321_v28  ;;  %p2846_p3 = pneg %p2845_p1  ;;  %p2851_p9 = scmp.lt.s32.totalorder %s2849_s29, %s2843_s9 }
  0x74   : > { %v3193_v55 = vpack.c.bf16 %v327_v39, %v324_v34  ;;  %v388_v56 = vsub.f32 %v3156_v24, %v387_v40  ;;  %v395_v57 = vsub.f32 %v3158_v25, %v394_v41  ;;  %v3198_v58 = vsub.f32 %v280_v29, %v324_v34 }
  0x75   : > { %v3200_v59 = vsub.f32 %v281_v30, %v327_v39  ;;  %v3202_v60 = vsub.f32 %v282_v32, %v330_v46  ;;  %v376_v61 = vand.u32 4294901760, %v3181_v45  ;;  %v3205_v62 = vpack.c.bf16 %v333_v47, %v330_v46  ;;  %p2852_p12 = por %p2851_p9, %p2850_p7 }
  0x76   : > { %2375 = vmatpush3.bf16.msra.mxu0 %v3152_v18  ;;  %v3207_v63 = vsub.f32 %v283_v35, %v333_v47  ;;  %v3209_v2 = vpack.c.bf16 %v339_v49, %v336_v48  ;;  %v3211_v3 = vsub.f32 %v284_v36, %v336_v48  ;;  %v3213_v4 = vsub.f32 %v285_v37, %v339_v49 }
  0x77   : > { %2376 = vmatprep.subr.bf16.mxu0 %v2920_v0  ;;  %v402_v5 = vsub.f32 %v3166_v33, %v401_v53  ;;  %v408_v6 = vand.u32 4294901760, %v3173_v42  ;;  %v415_v7 = vand.u32 4294901760, %v3175_v43  ;;  %v389_v8 = vand.u32 4294901760, %v388_v56  ;;  %p2853_p2 = pnand %p2852_p12, %p2846_p3 }
  0x78   : > { %v396_v9 = vand.u32 4294901760, %v395_v57  ;;  %v422_v10 = vand.u32 4294901760, %v3177_v44  ;;  %v429_v11 = vand.u32 4294901760, %v3183_v50  ;;  %v377_v14 = vsub.f32 %v3181_v45, %v376_v61 }
  0x79   : > { %v436_v15 = vand.u32 4294901760, %v3185_v51  ;;  %v443_v16 = vand.u32 4294901760, %v3187_v52  ;;  %v450_v17 = vand.u32 4294901760, %v3191_v54  ;;  %v457_v19 = vand.u32 4294901760, %v3198_v58 }
  0x7a   : > { %2378 = vmatpush3.bf16.msra.mxu0 %v3161_v26  ;;  %v464_v20 = vand.u32 4294901760, %v3200_v59  ;;  %v471_v21 = vand.u32 4294901760, %v3202_v60  ;;  %v478_v22 = vand.u32 4294901760, %v3207_v63  ;;  %v485_v23 = vand.u32 4294901760, %v3211_v3 }
  0x7b   : > { %2379 = vmatprep.subr.bf16.mxu0 %v2920_v0  ;;  %v492_v27 = vand.u32 4294901760, %v3213_v4  ;;  %v3234_v28 = vpack.c.bf16 %v394_v41, %v387_v40  ;;  %v3236_v29 = vpack.c.bf16 %v408_v6, %v401_v53  ;;  %v409_v30 = vsub.f32 %v3173_v42, %v408_v6 }
  0x7c   : > { %v3240_v32 = vpack.c.bf16 %v422_v10, %v415_v7  ;;  %v3242_v34 = vpack.c.bf16 %v436_v15, %v429_v11  ;;  %v3244_v35 = vpack.c.bf16 %v450_v17, %v443_v16  ;;  %v3247_v36 = vpack.c.bf16 %v464_v20, %v457_v19 }
  0x7d   : > { %v3249_v37 = vpack.c.bf16 %v478_v22, %v471_v21  ;;  %v3251_v39 = vpack.c.bf16 %v492_v27, %v485_v23  ;;  %v378_v40 = vand.u32 4294901760, %v377_v14  ;;  %v403_v41 = vand.u32 4294901760, %v402_v5 }
  0x7e   : > { %2381 = vmatpush3.bf16.msra.mxu0 %v3169_v38  ;;  %v2392_v46 = vpack.c.bf16 %v396_v9, %v389_v8  ;;  %v410_v47 = vand.u32 4294901760, %v409_v30  ;;  %v416_v48 = vsub.f32 %v3175_v43, %v415_v7  ;;  %v423_v49 = vsub.f32 %v3177_v44, %v422_v10 }
  0x7f   : > { %2382 = vmatprep.subr.bf16.mxu0 %v2920_v0  ;;  %v430_v53 = vsub.f32 %v3183_v50, %v429_v11  ;;  %v437_v14 = vsub.f32 %v3185_v51, %v436_v15  ;;  %v444_v5 = vsub.f32 %v3187_v52, %v443_v16  ;;  %v451_v10 = vsub.f32 %v3191_v54, %v450_v17 }
  0x80   : > { %v2395_v56 = vpack.c.bf16 %v410_v47, %v403_v41  ;;  %v417_v57 = vand.u32 4294901760, %v416_v48  ;;  %v424_v6 = vand.u32 4294901760, %v423_v49  ;;  %v458_v15 = vsub.f32 %v3198_v58, %v457_v19 }
  0x81   : > { %v431_v8 = vand.u32 4294901760, %v430_v53  ;;  %v438_v9 = vand.u32 4294901760, %v437_v14  ;;  %v445_v11 = vand.u32 4294901760, %v444_v5  ;;  %v465_v41 = vsub.f32 %v3200_v59, %v464_v20  ;;  %v961_v5 = vld [vmem:[#allocation7 + $0x60] sm:$0xff] }
  0x82   : > { %2384 = vmatpush3.bf16.msra.mxu0 %v3193_v55  ;;  %v2398_v7 = vpack.c.bf16 %v424_v6, %v417_v57  ;;  %v472_v16 = vsub.f32 %v3202_v60, %v471_v21  ;;  %v459_v47 = vand.u32 4294901760, %v458_v15  ;;  %v479_v17 = vsub.f32 %v3207_v63, %v478_v22  ;;  %v963_v15 = vld [vmem:[#allocation7 + $0x70] sm:$0xff] }
  0x83   : > { %2385 = vmatprep.subr.bf16.mxu0 %v2920_v0  ;;  %v2401_v30 = vpack.c.bf16 %v438_v9, %v431_v8  ;;  %v466_v48 = vand.u32 4294901760, %v465_v41  ;;  %v486_v19 = vsub.f32 %v3211_v3, %v485_v23  ;;  %v493_v20 = vsub.f32 %v3213_v4, %v492_v27 }
  0x84   : > { %v473_v49 = vand.u32 4294901760, %v472_v16  ;;  %v2416_v14 = vpack.c.bf16 %v3158_v25, %v3156_v24  ;;  %v2419_v23 = vpack.c.bf16 %v3173_v42, %v3166_v33  ;;  %v2422_v27 = vpack.c.bf16 %v3177_v44, %v3175_v43 }
  0x85   : > { %v2407_v53 = vpack.c.bf16 %v466_v48, %v459_v47  ;;  %v487_v57 = vand.u32 4294901760, %v486_v19  ;;  %v494_v6 = vand.u32 4294901760, %v493_v20  ;;  %v2425_v24 = vpack.c.bf16 %v3185_v51, %v3183_v50  ;;  %v964_v48 = vld [vmem:[#allocation7 + $0x78] sm:$0xff] }
  0x86   : > { %2387 = vmatpush3.bf16.msra.mxu0 %v3205_v62  ;;  %v2428_v25 = vpack.c.bf16 %v3191_v54, %v3187_v52  ;;  %v2431_v33 = vpack.c.bf16 %v3200_v59, %v3198_v58  ;;  %v2434_v42 = vpack.c.bf16 %v3207_v63, %v3202_v60  ;;  %v2437_v43 = vpack.c.bf16 %v3213_v4, %v3211_v3  ;;  %v953_v54 = vld [vmem:[#allocation7 + $0x20] sm:$0xff]  ;;  %v955_v60 = vld [vmem:[#allocation7 + $0x30] sm:$0xff]  ;;  %v958_v4 = vld [vmem:[#allocation7 + $0x48] sm:$0xff] }
  0x87   : > { %2388 = vmatprep.subr.bf16.mxu0 %v2920_v0  ;;  %v2413_v22 = vpack.c.bf16 %v494_v6, %v487_v57  ;;  %v957_v3 = vld [vmem:[#allocation7 + $0x40] sm:$0xff]  ;;  %v1009_v8 = vand.u32 4294901760, %v961_v5  ;;  %v1015_v57 = vand.u32 4294901760, %v963_v15  ;;  %v1018_v6 = vand.u32 4294901760, %v964_v48 }
  0x89   : > { %v3412_v20 = vsub.f32 %v961_v5, %v1009_v8 }
  0x8a   : > { %2390 = vmatpush3.bf16.msra.mxu0 %v3209_v2 }
  0x8b   : > { %2391 = vmatprep.subr.bf16.mxu0 %v2920_v0 }
  0x8d   : > { %1980 = vmatmul.mubr.f32.vlgmr.msra.gmra.mrb[0].mxu0 %v378_v40  ;;  %v452_v40 = vand.u32 4294901760, %v451_v10 }
  0x8e   : > { %2393 = vmatpush3.bf16.msra.mxu0 %v2392_v46  ;;  %2014 = vmatprep.mubr.msk.f32.mxu0 %vm2921_vm0, %v2922_v1 }
  0x8f   : > { %2394 = vmatprep.subr.bf16.mxu0 %v2920_v0  ;;  %v2404_v46 = vpack.c.bf16 %v452_v40, %v445_v11 }
  0x92   : > { %2396 = vmatpush3.bf16.msra.mxu0 %v2395_v56  ;;  %v480_v56 = vand.u32 4294901760, %v479_v17 }
  0x93   : > { %2397 = vmatprep.subr.bf16.mxu0 %v2920_v0 }
  0x94   : > { %v2410_v21 = vpack.c.bf16 %v480_v56, %v473_v49 }
  0x96   : > { %2399 = vmatpush3.bf16.msra.mxu0 %v2398_v7  ;;  %v962_v7 = vld [vmem:[#allocation7 + $0x68] sm:$0xff] }
  0x97   : > { %2400 = vmatprep.subr.bf16.mxu0 %v2920_v0  ;;  %v1012_v9 = vand.u32 4294901760, %v962_v7 }
  0x99   : > { %v3410_v19 = vpack.c.bf16 %v1012_v9, %v1009_v8 }
  0x9a   : > { %2402 = vmatpush3.bf16.msra.mxu0 %v2401_v30 }
  0x9b   : > { %2403 = vmatprep.subr.bf16.mxu0 %v2920_v0 }
  0x9e   : > { %2405 = vmatpush3.bf16.msra.mxu0 %v2404_v46 }
  0x9f   : > { %2406 = vmatprep.subr.bf16.mxu0 %v2920_v0 }
  0xa2   : > { %2408 = vmatpush3.bf16.msra.mxu0 %v2407_v53 }
  0xa3   : > { %2409 = vmatprep.subr.bf16.mxu0 %v2920_v0 }
  0xa6   : > { %2411 = vmatpush3.bf16.msra.mxu0 %v2410_v21  ;;  %v3414_v21 = vsub.f32 %v962_v7, %v1012_v9 }
  0xa7   : > { %2412 = vmatprep.subr.bf16.mxu0 %v2920_v0 }
  0xaa   : > { %2414 = vmatpush3.bf16.msra.mxu0 %v2413_v22 }
  0xab   : > { %2415 = vmatprep.subr.bf16.mxu0 %v2920_v0 }
  0xad   : > { %2015 = vmatmul.mubr.f32.vlgmr.msra.gmra.mrb[0].mxu0 %v3164_v31 }
  0xae   : > { %2417 = vmatpush3.bf16.msra.mxu0 %v2416_v14  ;;  %2049 = vmatprep.mubr.msk.f32.mxu0 %vm2921_vm0, %v2922_v1 }
  0xaf   : > { %2418 = vmatprep.subr.bf16.mxu0 %v2920_v0 }
  0xb2   : > { %2420 = vmatpush3.bf16.msra.mxu0 %v2419_v23  ;;  %v3419_v23 = vsub.f32 %v963_v15, %v1015_v57 }
  0xb3   : > { %2421 = vmatprep.subr.bf16.mxu0 %v2920_v0 }
  0xb6   : > { %2423 = vmatpush3.bf16.msra.mxu0 %v2422_v27  ;;  %v3422_v27 = vpack.c.bf16 %v1018_v6, %v1015_v57 }
  0xb7   : > { %2424 = vmatprep.subr.bf16.mxu0 %v2920_v0 }
  0xba   : > { %2426 = vmatpush3.bf16.msra.mxu0 %v2425_v24  ;;  %v3424_v24 = vsub.f32 %v964_v48, %v1018_v6 }
  0xbb   : > { %2427 = vmatprep.subr.bf16.mxu0 %v2920_v0 }
  0xbe   : > { %2429 = vmatpush3.bf16.msra.mxu0 %v2428_v25 }
  0xbf   : > { %2430 = vmatprep.subr.bf16.mxu0 %v2920_v0 }
  0xc2   : > { %2432 = vmatpush3.bf16.msra.mxu0 %v2431_v33 }
  0xc3   : > { %2433 = vmatprep.subr.bf16.mxu0 %v2920_v0 }
  0xc6   : > { %2435 = vmatpush3.bf16.msra.mxu0 %v2434_v42 }
  0xc7   : > { %2436 = vmatprep.subr.bf16.mxu0 %v2920_v0 }
  0xca   : > { %2438 = vmatpush3.bf16.msra.mxu0 %v2437_v43 }
  0xcb   : > { %2439 = vmatprep.subr.bf16.mxu0 %v2920_v0 }
  0xcd   : > { %2050 = vmatmul.mubr.f32.vlgmr.msra.gmra.mrb[0].mxu0 %v3181_v45  ;;  %v952_v45 = vld [vmem:[#allocation7 + $0x18] sm:$0xff] }
  0xce   : > { %2441 = vmatpush3.bf16.msra.mxu0 %v3145_v12  ;;  %2084 = vmatprep.mubr.msk.f32.mxu0 %vm2921_vm0, %v2922_v1  ;;  %v982_v51 = vand.u32 4294901760, %v952_v45 }
  0xcf   : > { %2442 = vmatprep.subr.bf16.mxu0 %v2920_v0 }
  0xd0   : > { %v3392_v40 = vsub.f32 %v952_v45, %v982_v51 }
  0xd2   : > { %2444 = vmatpush3.bf16.msra.mxu0 %v3148_v13  ;;  %v3701_v43 = vand.u32 4294901760, %v3392_v40 }
  0xd3   : > { %2445 = vmatprep.subr.bf16.mxu0 %v2920_v0 }
  0xd6   : > { %2447 = vmatpush3.bf16.msra.mxu0 %v3152_v18 }
  0xd7   : > { %2448 = vmatprep.subr.bf16.mxu0 %v2920_v0 }
  0xda   : > { %2450 = vmatpush3.bf16.msra.mxu0 %v3161_v26 }
  0xdb   : > { %2451 = vmatprep.subr.bf16.mxu0 %v2920_v0 }
  0xde   : > { %2453 = vmatpush3.bf16.msra.mxu0 %v3169_v38 }
  0xdf   : > { %2454 = vmatprep.subr.bf16.mxu0 %v2920_v0 }
  0xe2   : > { %2456 = vmatpush3.bf16.msra.mxu0 %v3193_v55 }
  0xe3   : > { %2457 = vmatprep.subr.bf16.mxu0 %v2920_v0 }
  0xe6   : > { %2459 = vmatpush3.bf16.msra.mxu0 %v3205_v62 }
  0xe7   : > { %2460 = vmatprep.subr.bf16.mxu0 %v2920_v0 }
  0xea   : > { %2462 = vmatpush3.bf16.msra.mxu0 %v3209_v2 }
  0xeb   : > { %2463 = vmatprep.subr.bf16.mxu0 %v2920_v0 }
  0xed   : > { %2085 = vmatmul.mubr.f32.vlgmr.msra.gmra.mrb[0].mxu0 %v376_v61  ;;  %v956_v61 = vld [vmem:[#allocation7 + $0x38] sm:$0xff] }
  0xee   : > { %2465 = vmatpush3.bf16.msra.mxu0 %v3234_v28  ;;  %2119 = vmatprep.mubr.msk.f32.mxu0 %vm2921_vm0, %v2922_v1  ;;  %v994_v63 = vand.u32 4294901760, %v956_v61  ;;  %v997_v28 = vand.u32 4294901760, %v957_v3 }
  0xef   : > { %2466 = vmatprep.subr.bf16.mxu0 %v2920_v0 }
  0xf0   : > { %v3400_v47 = vsub.f32 %v956_v61, %v994_v63  ;;  %v3402_v17 = vsub.f32 %v957_v3, %v997_v28 }
  0xf2   : > { %2468 = vmatpush3.bf16.msra.mxu0 %v3236_v29  ;;  %v1000_v29 = vand.u32 4294901760, %v958_v4 }
  0xf3   : > { %2469 = vmatprep.subr.bf16.mxu0 %v2920_v0 }
  0xf4   : > { %v3404_v49 = vsub.f32 %v958_v4, %v1000_v29 }
  0xf6   : > { %2471 = vmatpush3.bf16.msra.mxu0 %v3240_v32  ;;  %v3378_v32 = vpack.c.bf16 %v1000_v29, %v997_v28 }
  0xf7   : > { %2472 = vmatprep.subr.bf16.mxu0 %v2920_v0 }
  0xfa   : > { %2474 = vmatpush3.bf16.msra.mxu0 %v3242_v34  ;;  %v959_v34 = vld [vmem:[#allocation7 + $0x50] sm:$0xff] }
  0xfb   : > { %2475 = vmatprep.subr.bf16.mxu0 %v2920_v0 }
  0xfe   : > { %2477 = vmatpush3.bf16.msra.mxu0 %v3244_v35  ;;  %v960_v35 = vld [vmem:[#allocation7 + $0x58] sm:$0xff] }
  0xff   : > { %2478 = vmatprep.subr.bf16.mxu0 %v2920_v0 }
 0x102   : > { %2480 = vmatpush3.bf16.msra.mxu0 %v3247_v36  ;;  %v1003_v36 = vand.u32 4294901760, %v959_v34 }
 0x103   : > { %2481 = vmatprep.subr.bf16.mxu0 %v2920_v0 }
 0x104   : > { %v3406_v53 = vsub.f32 %v959_v34, %v1003_v36 }
 0x106   : > { %2483 = vmatpush3.bf16.msra.mxu0 %v3249_v37  ;;  %v1006_v37 = vand.u32 4294901760, %v960_v35  ;;  %v3694_v15 = vand.u32 4294901760, %v3406_v53 }
 0x107   : > { %2484 = vmatprep.subr.bf16.mxu0 %v2920_v0 }
 0x108   : > { %v3408_v56 = vsub.f32 %v960_v35, %v1006_v37  ;;  %v3696_v35 = vand.u32 4294901760, %v3402_v17  ;;  %v1137_v6 = vsub.f32 %v3406_v53, %v3694_v15 }
 0x10a   : > { %2486 = vmatpush3.bf16.msra.mxu0 %v3251_v39  ;;  %v3382_v39 = vpack.c.bf16 %v1006_v37, %v1003_v36  ;;  %v3695_v36 = vand.u32 4294901760, %v3404_v49  ;;  %v1123_v5 = vsub.f32 %v3402_v17, %v3696_v35  ;;  %v3693_v48 = vand.u32 4294901760, %v3408_v56 }
 0x10b   : > { %2487 = vmatprep.subr.bf16.mxu0 %v2920_v0 }
 0x10c   : > { %v1130_v7 = vsub.f32 %v3404_v49, %v3695_v36  ;;  %v1124_v8 = vand.u32 4294901760, %v1123_v5 }
 0x10d   : > { %2120 = vmatmul.mubr.f32.vlgmr.msra.gmra.mrb[0].mxu0 %v3164_v31 }
 0x10e   : > { %2489 = vmatpush3.bf16.msra.mxu0 %v3145_v12  ;;  %2154 = vmatprep.mubr.msk.f32.mxu0 %vm2921_vm0, %v2922_v1  ;;  %v949_v12 = vld [vmem:[#allocation7] sm:$0xff]  ;;  %v1131_v9 = vand.u32 4294901760, %v1130_v7 }
 0x10f   : > { %2490 = vmatprep.subr.bf16.mxu0 %v2920_v0 }
 0x110   : > { %v3476_v57 = vpack.c.bf16 %v1131_v9, %v1124_v8 }
 0x112   : > { %2492 = vmatpush3.bf16.msra.mxu0 %v3148_v13  ;;  %v950_v13 = vld [vmem:[#allocation7 + $0x8] sm:$0xff] }
 0x113   : > { %2493 = vmatprep.subr.bf16.mxu0 %v2920_v0 }
 0x116   : > { %2495 = vmatpush3.bf16.msra.mxu0 %v3152_v18  ;;  %v973_v18 = vand.u32 4294901760, %v949_v12 }
 0x117   : > { %2496 = vmatprep.subr.bf16.mxu0 %v2920_v0 }
 0x118   : > { %v3386_v10 = vsub.f32 %v949_v12, %v973_v18 }
 0x11a   : > { %2498 = vmatpush3.bf16.msra.mxu0 %v3161_v26  ;;  %v976_v26 = vand.u32 4294901760, %v950_v13  ;;  %v1066_v22 = vand.u32 4294901760, %v3386_v10 }
 0x11b   : > { %2499 = vmatprep.subr.bf16.mxu0 %v2920_v0 }
 0x11c   : > { %v3362_v44 = vpack.c.bf16 %v976_v26, %v973_v18  ;;  %v3388_v11 = vsub.f32 %v950_v13, %v976_v26  ;;  %v1067_v25 = vsub.f32 %v3386_v10, %v1066_v22  ;;  %v1088_v26 = vsub.f32 %v3392_v40, %v3701_v43 }
 0x11e   : > { %2501 = vmatpush3.bf16.msra.mxu0 %v3169_v38  ;;  %v951_v38 = vld [vmem:[#allocation7 + $0x10] sm:$0xff]  ;;  %2513 = vmatpush3.bf16.msra.mxu1 %v3362_v44  ;;  %v3703_v14 = vand.u32 4294901760, %v3388_v11  ;;  %v1068_v12 = vand.u32 4294901760, %v1067_v25  ;;  %v1144_v25 = vsub.f32 %v3408_v56, %v3693_v48  ;;  %v2560_v8 = vpack.c.bf16 %v3388_v11, %v3386_v10 }
 0x11f   : > { %2502 = vmatprep.subr.bf16.mxu0 %v2920_v0  ;;  %v979_v50 = vand.u32 4294901760, %v951_v38  ;;  %2514 = vmatprep.subr.bf16.mxu1 %v2920_v0 }
 0x120   : > { %v1074_v33 = vsub.f32 %v3388_v11, %v3703_v14 }
 0x121   : > { %v3366_v52 = vpack.c.bf16 %v982_v51, %v979_v50  ;;  %v3390_v30 = vsub.f32 %v951_v38, %v979_v50  ;;  %v1089_v50 = vand.u32 4294901760, %v1088_v26 }
 0x122   : > { %2504 = vmatpush3.bf16.msra.mxu0 %v3193_v55  ;;  %v954_v55 = vld [vmem:[#allocation7 + $0x28] sm:$0xff]  ;;  %v1075_v13 = vand.u32 4294901760, %v1074_v33  ;;  %v1138_v33 = vand.u32 4294901760, %v1137_v6 }
 0x123   : > { %2505 = vmatprep.subr.bf16.mxu0 %v2920_v0  ;;  %2516 = vmatpush3.bf16.msra.mxu1 %v3366_v52  ;;  %v988_v58 = vand.u32 4294901760, %v954_v55  ;;  %v3702_v42 = vand.u32 4294901760, %v3390_v30  ;;  %v2563_v9 = vpack.c.bf16 %v3392_v40, %v3390_v30 }
 0x124   : > { %2517 = vmatprep.subr.bf16.mxu1 %v2920_v0  ;;  %v3442_v38 = vpack.c.bf16 %v1075_v13, %v1068_v12  ;;  %v1145_v12 = vand.u32 4294901760, %v1144_v25  ;;  %v3692_v13 = vand.u32 4294901760, %v3412_v20 }
 0x125   : > { %v3396_v16 = vsub.f32 %v954_v55, %v988_v58  ;;  %v1081_v18 = vsub.f32 %v3390_v30, %v3702_v42 }
 0x126   : > { %2507 = vmatpush3.bf16.msra.mxu0 %v3205_v62  ;;  %v991_v62 = vand.u32 4294901760, %v955_v60  ;;  %v2551_v26 = vpack.c.bf16 %v1145_v12, %v1138_v33  ;;  %v2572_v33 = vpack.c.bf16 %v3404_v49, %v3402_v17  ;;  %v2575_v12 = vpack.c.bf16 %v3408_v56, %v3406_v53 }
 0x127   : > { %2508 = vmatprep.subr.bf16.mxu0 %v2920_v0  ;;  %v1082_v45 = vand.u32 4294901760, %v1081_v18  ;;  %v3691_v18 = vand.u32 4294901760, %v3414_v21 }
 0x128   : > { %v3398_v46 = vsub.f32 %v955_v60, %v991_v62 }
 0x129   : > { %v3446_v55 = vpack.c.bf16 %v1089_v50, %v1082_v45  ;;  %v1151_v45 = vsub.f32 %v3412_v20, %v3692_v13  ;;  %v1158_v50 = vsub.f32 %v3414_v21, %v3691_v18 }
 0x12a   : > { %2510 = vmatpush3.bf16.msra.mxu0 %v3209_v2  ;;  %v3374_v2 = vpack.c.bf16 %v994_v63, %v991_v62  ;;  %v3698_v62 = vand.u32 4294901760, %v3398_v46  ;;  %v3697_v63 = vand.u32 4294901760, %v3400_v47  ;;  %v2569_v25 = vpack.c.bf16 %v3400_v47, %v3398_v46 }
 0x12c   : > { %v1109_v4 = vsub.f32 %v3398_v46, %v3698_v62  ;;  %v1116_v28 = vsub.f32 %v3400_v47, %v3697_v63 }
 0x12d   : > { %2155 = vmatmul.mubr.f32.vlgmr.msra.gmra.mrb[0].mxu0 %v3164_v31  ;;  %v985_v31 = vand.u32 4294901760, %v953_v54 }
 0x12e   : > { %v1110_v29 = vand.u32 4294901760, %v1109_v4  ;;  %v1117_v34 = vand.u32 4294901760, %v1116_v28 }
 0x12f   : > { %v3370_v59 = vpack.c.bf16 %v988_v58, %v985_v31  ;;  %v3394_v41 = vsub.f32 %v953_v54, %v985_v31  ;;  %v3699_v54 = vand.u32 4294901760, %v3396_v16 }
 0x130   : > { %v3466_v37 = vpack.c.bf16 %v1117_v34, %v1110_v29 }
 0x131   : > { %2519 = vmatpush3.bf16.msra.mxu1 %v3370_v59  ;;  %v3700_v51 = vand.u32 4294901760, %v3394_v41  ;;  %v1102_v58 = vsub.f32 %v3396_v16, %v3699_v54  ;;  %v2566_v6 = vpack.c.bf16 %v3396_v16, %v3394_v41  ;;  %v3717_v10 = vand.u32 4294901760, %v3394_v41 }
 0x132   : > { %2520 = vmatprep.subr.bf16.mxu1 %v2920_v0 }
 0x133   : > { %v1095_v31 = vsub.f32 %v3394_v41, %v3700_v51  ;;  %v1103_v61 = vand.u32 4294901760, %v1102_v58  ;;  %v1159_v58 = vand.u32 4294901760, %v1158_v50  ;;  %v2581_v50 = vpack.c.bf16 %v3424_v24, %v3419_v23 }
 0x134   : > { %v3723_v41 = vand.u32 4294901760, %v3406_v53 }
 0x135   : > { %2522 = vmatpush3.bf16.msra.mxu1 %v3374_v2  ;;  %v1096_v60 = vand.u32 4294901760, %v1095_v31  ;;  %v1152_v31 = vand.u32 4294901760, %v1151_v45  ;;  %v2578_v45 = vpack.c.bf16 %v3414_v21, %v3412_v20 }
 0x136   : > { %2523 = vmatprep.subr.bf16.mxu1 %v2920_v0 }
 0x137   : > { %v3456_v3 = vpack.c.bf16 %v1103_v61, %v1096_v60  ;;  %v3690_v60 = vand.u32 4294901760, %v3419_v23  ;;  %v3689_v61 = vand.u32 4294901760, %v3424_v24  ;;  %v2554_v4 = vpack.c.bf16 %v1159_v58, %v1152_v31  ;;  %v1735_v31 = vld [vmem:[%s3682_s2] ss:$0 sm:$0xff] }
 0x139   : > { %2525 = vmatpush3.bf16.msra.mxu1 %v3378_v32  ;;  %v1165_v28 = vsub.f32 %v3419_v23, %v3690_v60  ;;  %v1172_v29 = vsub.f32 %v3424_v24, %v3689_v61 }
 0x13a   : > { %2526 = vmatprep.subr.bf16.mxu1 %v2920_v0 }
 0x13b   : > { %v1166_v34 = vand.u32 4294901760, %v1165_v28  ;;  %v1173_v5 = vand.u32 4294901760, %v1172_v29 }
 0x13d   : > { %2528 = vmatpush3.bf16.msra.mxu1 %v3382_v39  ;;  %v2557_v7 = vpack.c.bf16 %v1173_v5, %v1166_v34 }
 0x13e   : > { %2529 = vmatprep.subr.bf16.mxu1 %v2920_v0 }
 0x141   : > { %2531 = vmatpush3.bf16.msra.mxu1 %v3410_v19 }
 0x142   : > { %2532 = vmatprep.subr.bf16.mxu1 %v2920_v0 }
 0x145   : > { %2534 = vmatpush3.bf16.msra.mxu1 %v3422_v27 }
 0x146   : > { %2535 = vmatprep.subr.bf16.mxu1 %v2920_v0 }
 0x200   : > { %v930_v58 = vpop.f32.mrb[0].mxu0 }
 0x201   : > { %v2655_v28 = vadd.f32 %v1735_v31, %v930_v58  ;;  %v2156_v29 = vpop.f32.mrb[1].mxu0 }
 0x203   : > { %v1736_v34 = vclamps-f32 %v2655_v28, 7.999756 }
 0x205   : > { %v936_v5 = vmul.f32 4096.0, %v1736_v34 }
 0x207   : > { %v2677_v61 = vtrunc.f32 %v936_v5 }
 0x209   : > { %v2678_v60 = vcvt.f32.s32 %v2677_v61 }
 0x20b   : > { %v938_v18 = vcvt.s32.f32 %v2678_v60 }
 0x20d   : > { %v939_v13 = vmul.f32 0.00024414063, %v938_v18 }
 0x20f   : > { %v941_v48 = vmul.f32 0.70710677, %v939_v13  ;;  %v940_v36 = vmul.f32 0.5, %v939_v13 }
 0x211   : > { %2755 = verf.f32 %v941_v48 }
 0x21b   : > { %v2756_v15 = vpop.eup %2755 }
 0x21c   : > { %v943_v35 = vadd.f32 1.0, %v2756_v15 }
 0x21e   : > { %v944_v63 = vmul.f32 %v943_v35, %v940_v36 }
 0x220   : > { %v945_v62 = vmul.f32 4096.0, %v944_v63  ;;  %v3722_v63 = vand.u32 4294901760, %v3404_v49  ;;  %v3728_v49 = vand.u32 4294901760, %v3424_v24 }
 0x222   : > { %v2679_v54 = vtrunc.f32 %v945_v62  ;;  %v3721_v62 = vand.u32 4294901760, %v3402_v17  ;;  %v3727_v17 = vand.u32 4294901760, %v3419_v23 }
 0x224   : > { %v2680_v51 = vcvt.f32.s32 %v2679_v54 }
 0x226   : > { %v947_v43 = vcvt.s32.f32 %v2680_v51  ;;  %v3716_v51 = vand.u32 4294901760, %v3392_v40 }
 0x228   : > { %v948_v42 = vmul.f32 0.00024414063, %v947_v43 }
 0x22a   : > { %v3519_v14 = vand.u32 4294901760, %v948_v42 }
 0x22c   : > { %v1054_v31 = vsub.f32 %v948_v42, %v3519_v14  ;;  %v3714_v42 = vand.u32 4294901760, %v3388_v11  ;;  %v3718_v11 = vand.u32 4294901760, %v3396_v16  ;;  %v3724_v16 = vand.u32 4294901760, %v3408_v56 }
 0x22e   : > { %v1055_v58 = vand.u32 4294901760, %v1054_v31  ;;  %v2608_v43 = vpack.c.bf16 %v3714_v42, %v1066_v22  ;;  %v2614_v22 = vpack.c.bf16 %v3718_v11, %v3717_v10  ;;  %v2623_v35 = vpack.c.bf16 %v3724_v16, %v3723_v41 }
 0x230   : > { %v1056_v28 = vsub.f32 %v1054_v31, %v1055_v58 }
 0x232   : > { %v1057_v61 = vand.u32 4294901760, %v1056_v28 }
 0x234   : > { %2190 = vmatmul.mubr.f32.vlgmr.msra.gmra.mrb[0].mxu1 %v1057_v61 }
 0x235   : > { %2537 = vmatpush3.bf16.msra.mxu1 %v3442_v38  ;;  %2224 = vmatprep.mubr.msk.f32.mxu1 %vm2921_vm0, %v2922_v1  ;;  %v3715_v38 = vand.u32 4294901760, %v3390_v30  ;;  %v3720_v30 = vand.u32 4294901760, %v3400_v47  ;;  %v3726_v47 = vand.u32 4294901760, %v3414_v21 }
 0x236   : > { %2538 = vmatprep.subr.bf16.mxu1 %v2920_v0 }
 0x237   : > { %v2611_v54 = vpack.c.bf16 %v3716_v51, %v3715_v38 }
 0x239   : > { %2540 = vmatpush3.bf16.msra.mxu1 %v3446_v55  ;;  %v3719_v55 = vand.u32 4294901760, %v3398_v46  ;;  %v3725_v46 = vand.u32 4294901760, %v3412_v20 }
 0x23a   : > { %2541 = vmatprep.subr.bf16.mxu1 %v2920_v0 }
 0x23b   : > { %v2617_v40 = vpack.c.bf16 %v3720_v30, %v3719_v55  ;;  %v2626_v36 = vpack.c.bf16 %v3726_v47, %v3725_v46 }
 0x23d   : > { %2543 = vmatpush3.bf16.msra.mxu1 %v3456_v3  ;;  %v2620_v3 = vpack.c.bf16 %v3722_v63, %v3721_v62 }
 0x23e   : > { %2544 = vmatprep.subr.bf16.mxu1 %v2920_v0 }
 0x241   : > { %2546 = vmatpush3.bf16.msra.mxu1 %v3466_v37  ;;  %v2629_v37 = vpack.c.bf16 %v3728_v49, %v3727_v17 }
 0x242   : > { %2547 = vmatprep.subr.bf16.mxu1 %v2920_v0 }
 0x245   : > { %2549 = vmatpush3.bf16.msra.mxu1 %v3476_v57 }
 0x246   : > { %2550 = vmatprep.subr.bf16.mxu1 %v2920_v0 }
 0x249   : > { %2552 = vmatpush3.bf16.msra.mxu1 %v2551_v26 }
 0x24a   : > { %2553 = vmatprep.subr.bf16.mxu1 %v2920_v0 }
 0x24d   : > { %2555 = vmatpush3.bf16.msra.mxu1 %v2554_v4 }
 0x24e   : > { %2556 = vmatprep.subr.bf16.mxu1 %v2920_v0 }
 0x251   : > { %2558 = vmatpush3.bf16.msra.mxu1 %v2557_v7 }
 0x252   : > { %2559 = vmatprep.subr.bf16.mxu1 %v2920_v0 }
 0x254   : > { %2225 = vmatmul.mubr.f32.vlgmr.msra.gmra.mrb[0].mxu1 %v3519_v14 }
 0x255   : > { %2561 = vmatpush3.bf16.msra.mxu1 %v2560_v8  ;;  %2259 = vmatprep.mubr.msk.f32.mxu1 %vm2921_vm0, %v2922_v1 }
 0x256   : > { %2562 = vmatprep.subr.bf16.mxu1 %v2920_v0 }
 0x259   : > { %2564 = vmatpush3.bf16.msra.mxu1 %v2563_v9 }
 0x25a   : > { %2565 = vmatprep.subr.bf16.mxu1 %v2920_v0 }
 0x25d   : > { %2567 = vmatpush3.bf16.msra.mxu1 %v2566_v6 }
 0x25e   : > { %2568 = vmatprep.subr.bf16.mxu1 %v2920_v0 }
 0x261   : > { %2570 = vmatpush3.bf16.msra.mxu1 %v2569_v25 }
 0x262   : > { %2571 = vmatprep.subr.bf16.mxu1 %v2920_v0 }
 0x265   : > { %2573 = vmatpush3.bf16.msra.mxu1 %v2572_v33 }
 0x266   : > { %2574 = vmatprep.subr.bf16.mxu1 %v2920_v0 }
 0x269   : > { %2576 = vmatpush3.bf16.msra.mxu1 %v2575_v12 }
 0x26a   : > { %2577 = vmatprep.subr.bf16.mxu1 %v2920_v0 }
 0x26d   : > { %2579 = vmatpush3.bf16.msra.mxu1 %v2578_v45 }
 0x26e   : > { %2580 = vmatprep.subr.bf16.mxu1 %v2920_v0 }
 0x271   : > { %2582 = vmatpush3.bf16.msra.mxu1 %v2581_v50 }
 0x272   : > { %2583 = vmatprep.subr.bf16.mxu1 %v2920_v0 }
 0x274   : > { %2260 = vmatmul.mubr.f32.vlgmr.msra.gmra.mrb[0].mxu1 %v1054_v31 }
 0x275   : > { %2585 = vmatpush3.bf16.msra.mxu1 %v3362_v44  ;;  %2294 = vmatprep.mubr.msk.f32.mxu1 %vm2921_vm0, %v2922_v1 }
 0x276   : > { %2586 = vmatprep.subr.bf16.mxu1 %v2920_v0 }
 0x279   : > { %2588 = vmatpush3.bf16.msra.mxu1 %v3366_v52 }
 0x27a   : > { %2589 = vmatprep.subr.bf16.mxu1 %v2920_v0 }
 0x27d   : > { %2591 = vmatpush3.bf16.msra.mxu1 %v3370_v59 }
 0x27e   : > { %2592 = vmatprep.subr.bf16.mxu1 %v2920_v0 }
 0x281   : > { %2594 = vmatpush3.bf16.msra.mxu1 %v3374_v2 }
 0x282   : > { %2595 = vmatprep.subr.bf16.mxu1 %v2920_v0 }
 0x285   : > { %2597 = vmatpush3.bf16.msra.mxu1 %v3378_v32 }
 0x286   : > { %2598 = vmatprep.subr.bf16.mxu1 %v2920_v0 }
 0x289   : > { %2600 = vmatpush3.bf16.msra.mxu1 %v3382_v39 }
 0x28a   : > { %2601 = vmatprep.subr.bf16.mxu1 %v2920_v0 }
 0x28d   : > { %2603 = vmatpush3.bf16.msra.mxu1 %v3410_v19 }
 0x28e   : > { %2604 = vmatprep.subr.bf16.mxu1 %v2920_v0 }
 0x291   : > { %2606 = vmatpush3.bf16.msra.mxu1 %v3422_v27 }
 0x292   : > { %2607 = vmatprep.subr.bf16.mxu1 %v2920_v0 }
 0x294   : > { %2295 = vmatmul.mubr.f32.vlgmr.msra.gmra.mrb[0].mxu1 %v1055_v58 }
 0x295   : > { %2609 = vmatpush3.bf16.msra.mxu1 %v2608_v43  ;;  %2329 = vmatprep.mubr.msk.f32.mxu1 %vm2921_vm0, %v2922_v1 }
 0x296   : > { %2610 = vmatprep.subr.bf16.mxu1 %v2920_v0 }
 0x299   : > { %2612 = vmatpush3.bf16.msra.mxu1 %v2611_v54 }
 0x29a   : > { %2613 = vmatprep.subr.bf16.mxu1 %v2920_v0 }
 0x29d   : > { %2615 = vmatpush3.bf16.msra.mxu1 %v2614_v22 }
 0x29e   : > { %2616 = vmatprep.subr.bf16.mxu1 %v2920_v0 }
 0x2a1   : > { %2618 = vmatpush3.bf16.msra.mxu1 %v2617_v40 }
 0x2a2   : > { %2619 = vmatprep.subr.bf16.mxu1 %v2920_v0 }
 0x2a5   : > { %2621 = vmatpush3.bf16.msra.mxu1 %v2620_v3 }
 0x2a6   : > { %2622 = vmatprep.subr.bf16.mxu1 %v2920_v0 }
 0x2a9   : > { %2624 = vmatpush3.bf16.msra.mxu1 %v2623_v35 }
 0x2aa   : > { %2625 = vmatprep.subr.bf16.mxu1 %v2920_v0 }
 0x2ad   : > { %2627 = vmatpush3.bf16.msra.mxu1 %v2626_v36 }
 0x2ae   : > { %2628 = vmatprep.subr.bf16.mxu1 %v2920_v0 }
 0x2b1   : > { %2630 = vmatpush3.bf16.msra.mxu1 %v2629_v37 }
 0x2b2   : > { %2631 = vmatprep.subr.bf16.mxu1 %v2920_v0 }
 0x2b4   : > { %2330 = vmatmul.mubr.f32.vlgmr.msra.gmra.mrb[0].mxu1 %v3519_v14 }
 0x2b5   : > { %2633 = vmatpush3.bf16.msra.mxu1 %v3362_v44  ;;  %2364 = vmatprep.mubr.msk.f32.mxu1 %vm2921_vm0, %v2922_v1  ;;  %v1737_v1 = vld [vmem:[%s3684_s4] ss:$0 sm:$0xff] }
 0x2b6   : > { %2634 = vmatprep.subr.bf16.mxu1 %v2920_v0 }
 0x2b9   : > { %2636 = vmatpush3.bf16.msra.mxu1 %v3366_v52 }
 0x2ba   : > { %2637 = vmatprep.subr.bf16.mxu1 %v2920_v0 }
 0x2bd   : > { %2639 = vmatpush3.bf16.msra.mxu1 %v3370_v59 }
 0x2be   : > { %2640 = vmatprep.subr.bf16.mxu1 %v2920_v0 }
 0x2c1   : > { %2642 = vmatpush3.bf16.msra.mxu1 %v3374_v2 }
 0x2c2   : > { %2643 = vmatprep.subr.bf16.mxu1 %v2920_v0 }
 0x2c5   : > { %2645 = vmatpush3.bf16.msra.mxu1 %v3378_v32 }
 0x2c6   : > { %2646 = vmatprep.subr.bf16.mxu1 %v2920_v0 }
 0x2c9   : > { %2648 = vmatpush3.bf16.msra.mxu1 %v3382_v39 }
 0x2ca   : > { %2649 = vmatprep.subr.bf16.mxu1 %v2920_v0 }
 0x2cd   : > { %2651 = vmatpush3.bf16.msra.mxu1 %v3410_v19 }
 0x2ce   : > { %2652 = vmatprep.subr.bf16.mxu1 %v2920_v0 }
 0x2d1   : > { %2654 = vmatpush3.bf16.msra.mxu1 %v3422_v27 }
 0x2d4   : > { %2365 = vmatmul.mubr.f32.vlgmr.msra.gmra.mrb[0].mxu1 %v3519_v14 }
 0x3a7   : > { %v1609_v44 = vpop.f32.mrb[0].mxu1 }
 0x3a8   : > { %v2656_v52 = vadd.f32 %v1737_v1, %v1609_v44  ;;  %v2366_v59 = vpop.f32.mrb[1].mxu1 }
 0x3aa   : > { %v1738_v2 = vclamps-f32 %v2656_v52, 7.999756 }
 0x3ac   : > { %v1615_v32 = vmul.f32 4096.0, %v1738_v2 }
 0x3ae   : > { %v2681_v39 = vtrunc.f32 %v1615_v32 }
 0x3b0   : > { %v2682_v53 = vcvt.f32.s32 %v2681_v39 }
 0x3b2   : > { %v1617_v0 = vcvt.s32.f32 %v2682_v53 }
 0x3b4   : > { %v1618_v56 = vmul.f32 0.00024414063, %v1617_v0 }
 0x3b6   : > { %1619 = vst [vmem:[%s268_s28] sm:$0xff] %v1618_v56 }
 0x3b7   : > { %2856 = shalt.err (!%p2853_p2)
}
 0x3b8   : > { %s2857_s12 = scalar_lea.hbm %s3636_s15, 128  ;;  %s2861_s26 = scalar_lea.hbm %s3685_s5, 256 }
 0x3b9   : > { %p2858_p13 = scmp.ne.s32.totalorder %s3636_s15, %s2857_s12  ;;  %p2862_p4 = scmp.lt.u32.totalorder %s3636_s15, %s3685_s5 }
 0x3ba   : > { %p2863_p5 = scmp.lt.u32.totalorder %s2861_s26, %s2857_s12  ;;  %p2865_p11 = scmp.lt.u32.totalorder %s2857_s12, %s3636_s15 }
 0x3bb   : > { %p2859_p6 = pnand %p2858_p13, %p3729_p0 }
 0x3bc   : > { %p2864_p8 = por %p2863_p5, %p2862_p4 }
 0x3bd   : > { %p2860_p10 = pneg %p2859_p6 }
 0x3be   : > { %p2866_p1 = por %p2865_p11, %p2864_p8 }
 0x3c0   : > { %p2867_p3 = pnand %p2866_p1, %p2860_p10 }
 0x3c2   : > { %2870 = shalt.err (!%p2867_p3)
}
 0x3c3   : > { %2693 = dma.vmem_to_hbm [thread:$0]  (%p3729_p0), %s3638_s7, 128, %s3636_s15, %s1621_s16  }
 0x3c4 PF: > { %s1646_s11 = sand.u32 1, %s2901_s18   ;;  %p3730_p7 = scmp.ne.s32.totalorder %s3705_s25, 0 }
 0x3c5   : > { %p3731_p9 = scmp.ge.s32.totalorder %s2913_s21, 2  ;;  %s1647_s28 = scalar_lea.sflag [#allocation4], %s1646_s11 }
 0x3c7   : > { %p2707_p12 = pnand %p3731_p9, %p3730_p7 }
 0x3c9   : > { %2896 = dma.done.wait (!%p2707_p12), %s1647_s28, 128  }
 0x3ca   : > { %2898 = vsyncadd (!%p2707_p12), %s1647_s28, 4294967168  ;;  %p19_p2 = scmp.ge.s32.totalorder %s3064_s14, 4   ;;  %s3732_s18 = smov %s2905_s19 }
 0x3cb   : > { %s3733_s19 = smov %s2909_s20  ;;  %s3734_s20 = smov %s3080_s27 }
 0x3cc   : > { %s3735_s21 = smov %s3064_s14  ;;  %21 = sbr.rel (!%p19_p2) target bundleno = 6 (0x6), region = 93 }
 0x3d3   :  { %1652 = vsyncpa [#allocation3], 1 }
 0x3d4   :  { %1654 = vsyncpa [#allocation3 + $0x1], 1 }
 0x3d5   :  { %1655 = vsyncpa [#allocation6], 1 }
 0x3d6   :  { %1656 = vsyncpa [#allocation4], 1 }
 0x3d7   :  { %1658 = vsyncpa [#allocation4 + $0x1], 1 }

</bundles_post_ra>
